<compile_context>
chip_gen: v7x
topology: tpu7x:2x2x1
jax: 0.10.0
libtpu: 0.0.40
codegen_flags: <defaults>
</compile_context>

<pallas_src>
import functools
import math

import jax
import jax.numpy as jnp
from jax import lax
from jax.experimental import pallas as pl
from jax.experimental.pallas import tpu as pltpu


# ----------------------------------------------------------------------------
# Kernel
# ----------------------------------------------------------------------------

def _layernorm(x, a, b, eps):
    # Reference LayerNorm: a * (x - mean) / (std + eps) + b  with unbiased std
    # (divide by D-1) and eps added to the std.
    d = x.shape[-1]
    mean = jnp.mean(x, axis=-1, keepdims=True)
    diff = x - mean
    var = jnp.sum(diff * diff, axis=-1, keepdims=True) * (1.0 / (d - 1))
    return a * diff / (jnp.sqrt(var) + eps) + b


def fused_encoder_kernel(
    x_ref,                       # (S, D)   f32, one batch element
    wqkv_ref, bqkv_ref,          # (D, 3D)  bf16, (1, 3D) f32 (scale folded in)
    wo_ref, bo_ref,              # (D, D)   bf16, (1, D)  f32
    w1_ref, b1_ref,              # (D, F)   bf16, (1, F)  f32
    w2_ref, b2_ref,              # (F, D)   bf16, (1, D)  f32
    ln1_a_ref, ln1_b_ref,        # (1, D)   f32
    ln2_a_ref, ln2_b_ref,        # (1, D)   f32
    fn_a_ref, fn_b_ref,          # (1, D)   f32  (final Encoder.norm)
    o_ref,                       # (S, D)   f32
    act_ref,                     # (S, D)   f32 VMEM scratch (layer carry)
    *, num_heads, eps,
):
    f32 = jnp.float32
    bf16 = jnp.bfloat16

    layer = pl.program_id(1)
    n_layers = pl.num_programs(1)

    # Load the batch element from HBM-tile only at the first layer; afterwards
    # the activation stays resident in VMEM scratch across the L grid axis.
    @pl.when(layer == 0)
    def _():
        act_ref[...] = x_ref[...]

    x = act_ref[...]                                  # (S, D) f32
    S, D = x.shape
    H = num_heads
    dk = D // H

    # -------- sublayer 1: x + SelfAttn(LN1(x)) --------
    y = _layernorm(x, ln1_a_ref[...], ln1_b_ref[...], eps)
    y16 = y.astype(bf16)

    # One fused QKV matmul: (S, D) @ (D, 3D); 1/sqrt(dk) already folded into
    # the Wq / bq columns at parameter-construction time.
    qkv = jnp.dot(y16, wqkv_ref[...],
                  preferred_element_type=f32) + bqkv_ref[...]   # (S, 3D) f32

    head_outs = []
    for h in range(H):                                # static unroll (small H)
        qh = qkv[:, h * dk:(h + 1) * dk]
        kh = qkv[:, D + h * dk:D + (h + 1) * dk]
        vh = qkv[:, 2 * D + h * dk:2 * D + (h + 1) * dk]
        # scores = qh @ kh^T without materializing a transpose (scale folded).
        s = lax.dot_general(
            qh.astype(bf16), kh.astype(bf16),
            dimension_numbers=(((1,), (1,)), ((), ())),
            preferred_element_type=f32)               # (S, S) f32
        # softmax over keys; mask is None in the reference invocation.
        m = jnp.max(s, axis=-1, keepdims=True)
        e = jnp.exp(s - m)
        p = e * pl.reciprocal(jnp.sum(e, axis=-1, keepdims=True), approx=True)
        head_outs.append(jnp.dot(p.astype(bf16), vh.astype(bf16),
                                 preferred_element_type=f32))   # (S, dk)
    attn = jnp.concatenate(head_outs, axis=-1)        # (S, D) f32

    # Single full-K output projection: (S, D) @ (D, D).
    attn_proj = jnp.dot(attn.astype(bf16), wo_ref[...],
                        preferred_element_type=f32) + bo_ref[...]
    x = x + attn_proj                                 # residual

    # -------- sublayer 2: x + FFN(LN2(x)) --------
    y = _layernorm(x, ln2_a_ref[...], ln2_b_ref[...], eps)
    h1 = jnp.dot(y.astype(bf16), w1_ref[...],
                 preferred_element_type=f32) + b1_ref[...]
    h1 = jnp.maximum(h1, 0.0)                         # ReLU
    ff = jnp.dot(h1.astype(bf16), w2_ref[...],
                 preferred_element_type=f32) + b2_ref[...]
    out = x + ff

    act_ref[...] = out                                # carry to next layer

    # -------- Encoder.norm applied after the last layer --------
    @pl.when(layer == n_layers - 1)
    def _():
        o_ref[...] = _layernorm(out, fn_a_ref[...], fn_b_ref[...], eps)


# ----------------------------------------------------------------------------
# Wrapper
# ----------------------------------------------------------------------------

def encoder_forward(x, params, *, num_heads, eps=1e-6):
    B, S, D = x.shape
    L = params["wqkv"].shape[0]
    F = params["w1"].shape[-1]
    H = num_heads

    kern = functools.partial(fused_encoder_kernel, num_heads=num_heads, eps=eps)

    def per_layer(*shape):
        # Weight indexed by the L grid coordinate -> BlockSpec pipeline
        # prefetches the next layer's weights while this layer computes.
        return pl.BlockSpec((None,) + shape,
                            lambda b, l, _s=len(shape): (l,) + (0,) * _s)

    def const(*shape):
        # Grid-constant block (final Encoder.norm params): stays VMEM-resident.
        return pl.BlockSpec(shape, lambda b, l, _s=len(shape): (0,) * _s)

    # Advisory cost estimate (per review): flops/bytes for the whole encoder.
    flops_per_be_layer = (8 * S * D * D        # QKV (6SD^2) + out-proj (2SD^2)
                          + 4 * S * S * D      # scores + PV over all heads
                          + 4 * S * D * F)     # FFN
    weight_bytes_layer = 2 * (3 * D * D + D * D + 2 * D * F) + \
        4 * (3 * D + D + F + D + 4 * D)
    cost = pl.CostEstimate(
        flops=B * L * flops_per_be_layer,
        transcendentals=B * L * (H * S * S + 2 * S),
        bytes_accessed=B * L * weight_bytes_layer + 2 * B * S * D * 4)

    return pl.pallas_call(
        kern,
        out_shape=jax.ShapeDtypeStruct((B, S, D), jnp.float32),
        grid=(B, L),
        in_specs=[
            pl.BlockSpec((None, S, D), lambda b, l: (b, 0, 0)),   # x, per batch
            per_layer(D, 3 * D), per_layer(1, 3 * D),             # wqkv, bqkv
            per_layer(D, D), per_layer(1, D),                     # wo, bo
            per_layer(D, F), per_layer(1, F),                     # w1, b1
            per_layer(F, D), per_layer(1, D),                     # w2, b2
            per_layer(1, D), per_layer(1, D),                     # ln1 a, b
            per_layer(1, D), per_layer(1, D),                     # ln2 a, b
            const(1, D), const(1, D),                             # final norm
        ],
        out_specs=pl.BlockSpec((None, S, D), lambda b, l: (b, 0, 0)),
        scratch_shapes=[pltpu.VMEM((S, D), jnp.float32)],
        compiler_params=pltpu.CompilerParams(
            dimension_semantics=("parallel", "arbitrary"),
            vmem_limit_bytes=32 * 1024 * 1024),
        cost_estimate=cost,
    )(x,
      params["wqkv"], params["bqkv"], params["wo"], params["bo"],
      params["w1"], params["b1"], params["w2"], params["b2"],
      params["ln1_a"], params["ln1_b"], params["ln2_a"], params["ln2_b"],
      params["norm_a"], params["norm_b"])


# ----------------------------------------------------------------------------
# Deterministic parameter construction
# ----------------------------------------------------------------------------

def make_params(key, n_layers, d_model, d_ff, num_heads):
    f32, bf16 = jnp.float32, jnp.bfloat16
    dk = d_model // num_heads
    scale = 1.0 / math.sqrt(dk)

    wqkv_l, bqkv_l, wo_l, bo_l = [], [], [], []
    w1_l, b1_l, w2_l, b2_l = [], [], [], []
    ln1a_l, ln1b_l, ln2a_l, ln2b_l = [], [], [], []

    for li in range(n_layers):
        k = jax.random.fold_in(key, li)
        ks = jax.random.split(k, 12)
        wq = 0.02 * jax.random.normal(ks[0], (d_model, d_model), f32)
        wk = 0.02 * jax.random.normal(ks[1], (d_model, d_model), f32)
        wv = 0.02 * jax.random.normal(ks[2], (d_model, d_model), f32)
        wo = 0.02 * jax.random.normal(ks[3], (d_model, d_model), f32)
        w1 = 0.02 * jax.random.normal(ks[4], (d_model, d_ff), f32)
        w2 = 0.02 * jax.random.normal(ks[5], (d_ff, d_model), f32)
        bq = 0.02 * jax.random.normal(ks[6], (d_model,), f32)
        bk = 0.02 * jax.random.normal(ks[7], (d_model,), f32)
        bv = 0.02 * jax.random.normal(ks[8], (d_model,), f32)
        bo = 0.02 * jax.random.normal(ks[9], (d_model,), f32)
        b1 = 0.02 * jax.random.normal(ks[10], (d_ff,), f32)
        b2 = 0.02 * jax.random.normal(ks[11], (d_model,), f32)

        # Fold the 1/sqrt(dk) attention scale into Wq / bq, pack QKV together.
        wqkv_l.append(jnp.concatenate([wq * scale, wk, wv], axis=1).astype(bf16))
        bqkv_l.append(jnp.concatenate([bq * scale, bk, bv])[None, :].astype(f32))
        wo_l.append(wo.astype(bf16)); bo_l.append(bo[None, :])
        w1_l.append(w1.astype(bf16)); b1_l.append(b1[None, :])
        w2_l.append(w2.astype(bf16)); b2_l.append(b2[None, :])
        ln1a_l.append(jnp.ones((1, d_model), f32))
        ln1b_l.append(jnp.zeros((1, d_model), f32))
        ln2a_l.append(jnp.ones((1, d_model), f32))
        ln2b_l.append(jnp.zeros((1, d_model), f32))

    return {
        "wqkv": jnp.stack(wqkv_l), "bqkv": jnp.stack(bqkv_l),
        "wo": jnp.stack(wo_l), "bo": jnp.stack(bo_l),
        "w1": jnp.stack(w1_l), "b1": jnp.stack(b1_l),
        "w2": jnp.stack(w2_l), "b2": jnp.stack(b2_l),
        "ln1_a": jnp.stack(ln1a_l), "ln1_b": jnp.stack(ln1b_l),
        "ln2_a": jnp.stack(ln2a_l), "ln2_b": jnp.stack(ln2b_l),
        "norm_a": jnp.ones((1, d_model), f32),   # Encoder.norm.a_2
        "norm_b": jnp.zeros((1, d_model), f32),  # Encoder.norm.b_2
    }


# ----------------------------------------------------------------------------
# Main
# ----------------------------------------------------------------------------

if __name__ == "__main__":
    B, S, D = 2, 8, 32          # batch, seq, d_model (= layer.size)
    N_LAYERS = 2
    N_HEADS = 4
    D_FF = 64

    key = jax.random.PRNGKey(0)
    k_x, k_p = jax.random.split(key)
    x = jax.random.normal(k_x, (B, S, D), jnp.float32)
    params = make_params(k_p, N_LAYERS, D, D_FF, N_HEADS)

    fwd = jax.jit(functools.partial(encoder_forward, num_heads=N_HEADS))
    out = fwd(x, params)
    jax.block_until_ready(out)

    assert out.shape == (B, S, D)
    assert bool(jnp.all(jnp.isfinite(out)))
    print("KERNEL_OK")
</pallas_src>

<mosaic_0001>
module attributes {stable_mosaic.version = 11 : i64} {
  func.func @fused_encoder_kernel(%arg0: i32, %arg1: i32, %arg2: memref<1x8x32xf32, #tpu.memory_space<vmem>>, %arg3: memref<1x32x96xbf16, #tpu.memory_space<vmem>>, %arg4: memref<1x1x96xf32, #tpu.memory_space<vmem>>, %arg5: memref<1x32x32xbf16, #tpu.memory_space<vmem>>, %arg6: memref<1x1x32xf32, #tpu.memory_space<vmem>>, %arg7: memref<1x32x64xbf16, #tpu.memory_space<vmem>>, %arg8: memref<1x1x64xf32, #tpu.memory_space<vmem>>, %arg9: memref<1x64x32xbf16, #tpu.memory_space<vmem>>, %arg10: memref<1x1x32xf32, #tpu.memory_space<vmem>>, %arg11: memref<1x1x32xf32, #tpu.memory_space<vmem>>, %arg12: memref<1x1x32xf32, #tpu.memory_space<vmem>>, %arg13: memref<1x1x32xf32, #tpu.memory_space<vmem>>, %arg14: memref<1x1x32xf32, #tpu.memory_space<vmem>>, %arg15: memref<1x32xf32, #tpu.memory_space<vmem>>, %arg16: memref<1x32xf32, #tpu.memory_space<vmem>>, %arg17: memref<1x8x32xf32, #tpu.memory_space<vmem>>, %arg18: memref<8x32xf32, #tpu.memory_space<vmem>>) attributes {dimension_semantics = [#tpu.dimension_semantics<parallel>, #tpu.dimension_semantics<arbitrary>], iteration_bounds = array<i64: 2, 2>, scalar_prefetch = 0 : i64, scratch_operands = 1 : i64, tpu.core_type = #tpu.core_type<tc>, window_params = [{transform_indices = @transform_0, window_bounds = array<i64: 1, 8, 32>}, {transform_indices = @transform_1, window_bounds = array<i64: 1, 32, 96>}, {transform_indices = @transform_2, window_bounds = array<i64: 1, 1, 96>}, {transform_indices = @transform_3, window_bounds = array<i64: 1, 32, 32>}, {transform_indices = @transform_4, window_bounds = array<i64: 1, 1, 32>}, {transform_indices = @transform_5, window_bounds = array<i64: 1, 32, 64>}, {transform_indices = @transform_6, window_bounds = array<i64: 1, 1, 64>}, {transform_indices = @transform_7, window_bounds = array<i64: 1, 64, 32>}, {transform_indices = @transform_8, window_bounds = array<i64: 1, 1, 32>}, {transform_indices = @transform_9, window_bounds = array<i64: 1, 1, 32>}, {transform_indices = @transform_10, window_bounds = array<i64: 1, 1, 32>}, {transform_indices = @transform_11, window_bounds = array<i64: 1, 1, 32>}, {transform_indices = @transform_12, window_bounds = array<i64: 1, 1, 32>}, {pipeline_mode = #tpu.pipeline_mode<synchronous>, transform_indices = @transform_13, window_bounds = array<i64: 1, 32>}, {pipeline_mode = #tpu.pipeline_mode<synchronous>, transform_indices = @transform_14, window_bounds = array<i64: 1, 32>}, {transform_indices = @transform_15, window_bounds = array<i64: 1, 8, 32>}]} {
    %c0_i32 = arith.constant 0 : i32
    %0 = arith.cmpi eq, %arg1, %c0_i32 : i32
    %1 = arith.extui %0 : i1 to i32
    %c0_i32_0 = arith.constant 0 : i32
    %2 = arith.cmpi ne, %1, %c0_i32_0 : i32
    scf.if %2 {
      %c0_71 = arith.constant 0 : index
      %c0_72 = arith.constant 0 : index
      %c0_73 = arith.constant 0 : index
      %169 = vector.load %arg2[%c0_71, %c0_72, %c0_73] : memref<1x8x32xf32, #tpu.memory_space<vmem>>, vector<1x8x32xf32>
      %170 = vector.shape_cast %169 : vector<1x8x32xf32> to vector<8x32xf32>
      %c0_74 = arith.constant 0 : index
      %c0_75 = arith.constant 0 : index
      %171 = vector.load %arg18[%c0_74, %c0_75] : memref<8x32xf32, #tpu.memory_space<vmem>>, vector<8x32xf32>
      tpu.vector_store %arg18[%c0_74, %c0_75], %170 {strides = array<i32>} : memref<8x32xf32, #tpu.memory_space<vmem>>, vector<8x32xf32>,
    } else {
    }
    %c0 = arith.constant 0 : index
    %c0_1 = arith.constant 0 : index
    %3 = vector.load %arg18[%c0, %c0_1] : memref<8x32xf32, #tpu.memory_space<vmem>>, vector<8x32xf32>
    %c0_2 = arith.constant 0 : index
    %c0_3 = arith.constant 0 : index
    %c0_4 = arith.constant 0 : index
    %4 = vector.load %arg11[%c0_2, %c0_3, %c0_4] : memref<1x1x32xf32, #tpu.memory_space<vmem>>, vector<1x1x32xf32>
    %5 = vector.shape_cast %4 : vector<1x1x32xf32> to vector<1x32xf32>
    %c0_5 = arith.constant 0 : index
    %c0_6 = arith.constant 0 : index
    %c0_7 = arith.constant 0 : index
    %6 = vector.load %arg12[%c0_5, %c0_6, %c0_7] : memref<1x1x32xf32, #tpu.memory_space<vmem>>, vector<1x1x32xf32>
    %7 = vector.shape_cast %6 : vector<1x1x32xf32> to vector<1x32xf32>
    %cst = arith.constant dense<0.000000e+00> : vector<8xf32>
    %8 = vector.multi_reduction <add>, %3, %cst [1] : vector<8x32xf32> to vector<8xf32>
    %9 = vector.shape_cast %8 : vector<8xf32> to vector<8x1xf32>
    %cst_8 = arith.constant 3.200000e+01 : f32
    %10 = vector.broadcast %cst_8 : f32 to vector<8x1xf32>
    %11 = arith.divf %9, %10 : vector<8x1xf32>
    %12 = vector.broadcast %11 : vector<8x1xf32> to vector<8x32xf32>
    %13 = arith.subf %3, %12 : vector<8x32xf32>
    %14 = arith.mulf %13, %13 : vector<8x32xf32>
    %cst_9 = arith.constant dense<0.000000e+00> : vector<8xf32>
    %15 = vector.multi_reduction <add>, %14, %cst_9 [1] : vector<8x32xf32> to vector<8xf32>
    %16 = vector.shape_cast %15 : vector<8xf32> to vector<8x1xf32>
    %cst_10 = arith.constant 0.0322580636 : f32
    %17 = vector.broadcast %cst_10 : f32 to vector<8x1xf32>
    %18 = arith.mulf %16, %17 : vector<8x1xf32>
    %19 = vector.broadcast %5 : vector<1x32xf32> to vector<8x32xf32>
    %20 = arith.mulf %19, %13 : vector<8x32xf32>
    %21 = math.sqrt %18 : vector<8x1xf32>
    %cst_11 = arith.constant 9.99999997E-7 : f32
    %22 = vector.broadcast %cst_11 : f32 to vector<8x1xf32>
    %23 = arith.addf %21, %22 : vector<8x1xf32>
    %24 = vector.broadcast %23 : vector<8x1xf32> to vector<8x32xf32>
    %25 = arith.divf %20, %24 : vector<8x32xf32>
    %26 = vector.broadcast %7 : vector<1x32xf32> to vector<8x32xf32>
    %27 = arith.addf %25, %26 : vector<8x32xf32>
    %28 = arith.truncf %27 : vector<8x32xf32> to vector<8x32xbf16>
    %c0_12 = arith.constant 0 : index
    %c0_13 = arith.constant 0 : index
    %c0_14 = arith.constant 0 : index
    %29 = vector.load %arg3[%c0_12, %c0_13, %c0_14] : memref<1x32x96xbf16, #tpu.memory_space<vmem>>, vector<1x32x96xbf16>
    %30 = vector.shape_cast %29 : vector<1x32x96xbf16> to vector<32x96xbf16>
    %cst_15 = arith.constant dense<0.000000e+00> : vector<8x96xf32>
    %31 = tpu.matmul %28, %30, %cst_15 {dimension_numbers = #tpu.dot_dimension_numbers<[1], [0], [0], [1], [0, 0, 1, 1], [], []>} : vector<8x32xbf16>, vector<32x96xbf16>, vector<8x96xf32> -> vector<8x96xf32>
    %c0_16 = arith.constant 0 : index
    %c0_17 = arith.constant 0 : index
    %c0_18 = arith.constant 0 : index
    %32 = vector.load %arg4[%c0_16, %c0_17, %c0_18] : memref<1x1x96xf32, #tpu.memory_space<vmem>>, vector<1x1x96xf32>
    %33 = vector.shape_cast %32 : vector<1x1x96xf32> to vector<1x96xf32>
    %34 = vector.broadcast %33 : vector<1x96xf32> to vector<8x96xf32>
    %35 = arith.addf %31, %34 : vector<8x96xf32>
    %36 = vector.extract_strided_slice %35 {offsets = [0, 0], sizes = [8, 8], strides = [1, 1]} : vector<8x96xf32> to vector<8x8xf32>
    %37 = vector.extract_strided_slice %35 {offsets = [0, 32], sizes = [8, 8], strides = [1, 1]} : vector<8x96xf32> to vector<8x8xf32>
    %38 = vector.extract_strided_slice %35 {offsets = [0, 64], sizes = [8, 8], strides = [1, 1]} : vector<8x96xf32> to vector<8x8xf32>
    %39 = arith.truncf %36 : vector<8x8xf32> to vector<8x8xbf16>
    %40 = arith.truncf %37 : vector<8x8xf32> to vector<8x8xbf16>
    %cst_19 = arith.constant dense<0.000000e+00> : vector<8x8xf32>
    %41 = tpu.matmul %39, %40, %cst_19 {dimension_numbers = #tpu.dot_dimension_numbers<[1], [1], [0], [0], [0, 0, 1, 0], [], []>} : vector<8x8xbf16>, vector<8x8xbf16>, vector<8x8xf32> -> vector<8x8xf32>
    %cst_20 = arith.constant dense<0xFF800000> : vector<8xf32>
    %42 = vector.multi_reduction <maximumf>, %41, %cst_20 [1] : vector<8x8xf32> to vector<8xf32>
    %43 = vector.shape_cast %42 : vector<8xf32> to vector<8x1xf32>
    %44 = vector.broadcast %43 : vector<8x1xf32> to vector<8x8xf32>
    %45 = arith.subf %41, %44 : vector<8x8xf32>
    %46 = math.exp %45 : vector<8x8xf32>
    %cst_21 = arith.constant dense<0.000000e+00> : vector<8xf32>
    %47 = vector.multi_reduction <add>, %46, %cst_21 [1] : vector<8x8xf32> to vector<8xf32>
    %48 = vector.shape_cast %47 : vector<8xf32> to vector<8x1xf32>
    %49 = tpu.reciprocal %48 {approx = true} : vector<8x1xf32> -> vector<8x1xf32>
    %50 = vector.broadcast %49 : vector<8x1xf32> to vector<8x8xf32>
    %51 = arith.mulf %46, %50 : vector<8x8xf32>
    %52 = arith.truncf %51 : vector<8x8xf32> to vector<8x8xbf16>
    %53 = arith.truncf %38 : vector<8x8xf32> to vector<8x8xbf16>
    %cst_22 = arith.constant dense<0.000000e+00> : vector<8x8xf32>
    %54 = tpu.matmul %52, %53, %cst_22 {dimension_numbers = #tpu.dot_dimension_numbers<[1], [0], [0], [1], [0, 0, 1, 1], [], []>} : vector<8x8xbf16>, vector<8x8xbf16>, vector<8x8xf32> -> vector<8x8xf32>
    %55 = vector.extract_strided_slice %35 {offsets = [0, 8], sizes = [8, 8], strides = [1, 1]} : vector<8x96xf32> to vector<8x8xf32>
    %56 = vector.extract_strided_slice %35 {offsets = [0, 40], sizes = [8, 8], strides = [1, 1]} : vector<8x96xf32> to vector<8x8xf32>
    %57 = vector.extract_strided_slice %35 {offsets = [0, 72], sizes = [8, 8], strides = [1, 1]} : vector<8x96xf32> to vector<8x8xf32>
    %58 = arith.truncf %55 : vector<8x8xf32> to vector<8x8xbf16>
    %59 = arith.truncf %56 : vector<8x8xf32> to vector<8x8xbf16>
    %cst_23 = arith.constant dense<0.000000e+00> : vector<8x8xf32>
    %60 = tpu.matmul %58, %59, %cst_23 {dimension_numbers = #tpu.dot_dimension_numbers<[1], [1], [0], [0], [0, 0, 1, 0], [], []>} : vector<8x8xbf16>, vector<8x8xbf16>, vector<8x8xf32> -> vector<8x8xf32>
    %cst_24 = arith.constant dense<0xFF800000> : vector<8xf32>
    %61 = vector.multi_reduction <maximumf>, %60, %cst_24 [1] : vector<8x8xf32> to vector<8xf32>
    %62 = vector.shape_cast %61 : vector<8xf32> to vector<8x1xf32>
    %63 = vector.broadcast %62 : vector<8x1xf32> to vector<8x8xf32>
    %64 = arith.subf %60, %63 : vector<8x8xf32>
    %65 = math.exp %64 : vector<8x8xf32>
    %cst_25 = arith.constant dense<0.000000e+00> : vector<8xf32>
    %66 = vector.multi_reduction <add>, %65, %cst_25 [1] : vector<8x8xf32> to vector<8xf32>
    %67 = vector.shape_cast %66 : vector<8xf32> to vector<8x1xf32>
    %68 = tpu.reciprocal %67 {approx = true} : vector<8x1xf32> -> vector<8x1xf32>
    %69 = vector.broadcast %68 : vector<8x1xf32> to vector<8x8xf32>
    %70 = arith.mulf %65, %69 : vector<8x8xf32>
    %71 = arith.truncf %70 : vector<8x8xf32> to vector<8x8xbf16>
    %72 = arith.truncf %57 : vector<8x8xf32> to vector<8x8xbf16>
    %cst_26 = arith.constant dense<0.000000e+00> : vector<8x8xf32>
    %73 = tpu.matmul %71, %72, %cst_26 {dimension_numbers = #tpu.dot_dimension_numbers<[1], [0], [0], [1], [0, 0, 1, 1], [], []>} : vector<8x8xbf16>, vector<8x8xbf16>, vector<8x8xf32> -> vector<8x8xf32>
    %74 = vector.extract_strided_slice %35 {offsets = [0, 16], sizes = [8, 8], strides = [1, 1]} : vector<8x96xf32> to vector<8x8xf32>
    %75 = vector.extract_strided_slice %35 {offsets = [0, 48], sizes = [8, 8], strides = [1, 1]} : vector<8x96xf32> to vector<8x8xf32>
    %76 = vector.extract_strided_slice %35 {offsets = [0, 80], sizes = [8, 8], strides = [1, 1]} : vector<8x96xf32> to vector<8x8xf32>
    %77 = arith.truncf %74 : vector<8x8xf32> to vector<8x8xbf16>
    %78 = arith.truncf %75 : vector<8x8xf32> to vector<8x8xbf16>
    %cst_27 = arith.constant dense<0.000000e+00> : vector<8x8xf32>
    %79 = tpu.matmul %77, %78, %cst_27 {dimension_numbers = #tpu.dot_dimension_numbers<[1], [1], [0], [0], [0, 0, 1, 0], [], []>} : vector<8x8xbf16>, vector<8x8xbf16>, vector<8x8xf32> -> vector<8x8xf32>
    %cst_28 = arith.constant dense<0xFF800000> : vector<8xf32>
    %80 = vector.multi_reduction <maximumf>, %79, %cst_28 [1] : vector<8x8xf32> to vector<8xf32>
    %81 = vector.shape_cast %80 : vector<8xf32> to vector<8x1xf32>
    %82 = vector.broadcast %81 : vector<8x1xf32> to vector<8x8xf32>
    %83 = arith.subf %79, %82 : vector<8x8xf32>
    %84 = math.exp %83 : vector<8x8xf32>
    %cst_29 = arith.constant dense<0.000000e+00> : vector<8xf32>
    %85 = vector.multi_reduction <add>, %84, %cst_29 [1] : vector<8x8xf32> to vector<8xf32>
    %86 = vector.shape_cast %85 : vector<8xf32> to vector<8x1xf32>
    %87 = tpu.reciprocal %86 {approx = true} : vector<8x1xf32> -> vector<8x1xf32>
    %88 = vector.broadcast %87 : vector<8x1xf32> to vector<8x8xf32>
    %89 = arith.mulf %84, %88 : vector<8x8xf32>
    %90 = arith.truncf %89 : vector<8x8xf32> to vector<8x8xbf16>
    %91 = arith.truncf %76 : vector<8x8xf32> to vector<8x8xbf16>
    %cst_30 = arith.constant dense<0.000000e+00> : vector<8x8xf32>
    %92 = tpu.matmul %90, %91, %cst_30 {dimension_numbers = #tpu.dot_dimension_numbers<[1], [0], [0], [1], [0, 0, 1, 1], [], []>} : vector<8x8xbf16>, vector<8x8xbf16>, vector<8x8xf32> -> vector<8x8xf32>
    %93 = vector.extract_strided_slice %35 {offsets = [0, 24], sizes = [8, 8], strides = [1, 1]} : vector<8x96xf32> to vector<8x8xf32>
    %94 = vector.extract_strided_slice %35 {offsets = [0, 56], sizes = [8, 8], strides = [1, 1]} : vector<8x96xf32> to vector<8x8xf32>
    %95 = vector.extract_strided_slice %35 {offsets = [0, 88], sizes = [8, 8], strides = [1, 1]} : vector<8x96xf32> to vector<8x8xf32>
    %96 = arith.truncf %93 : vector<8x8xf32> to vector<8x8xbf16>
    %97 = arith.truncf %94 : vector<8x8xf32> to vector<8x8xbf16>
    %cst_31 = arith.constant dense<0.000000e+00> : vector<8x8xf32>
    %98 = tpu.matmul %96, %97, %cst_31 {dimension_numbers = #tpu.dot_dimension_numbers<[1], [1], [0], [0], [0, 0, 1, 0], [], []>} : vector<8x8xbf16>, vector<8x8xbf16>, vector<8x8xf32> -> vector<8x8xf32>
    %cst_32 = arith.constant dense<0xFF800000> : vector<8xf32>
    %99 = vector.multi_reduction <maximumf>, %98, %cst_32 [1] : vector<8x8xf32> to vector<8xf32>
    %100 = vector.shape_cast %99 : vector<8xf32> to vector<8x1xf32>
    %101 = vector.broadcast %100 : vector<8x1xf32> to vector<8x8xf32>
    %102 = arith.subf %98, %101 : vector<8x8xf32>
    %103 = math.exp %102 : vector<8x8xf32>
    %cst_33 = arith.constant dense<0.000000e+00> : vector<8xf32>
    %104 = vector.multi_reduction <add>, %103, %cst_33 [1] : vector<8x8xf32> to vector<8xf32>
    %105 = vector.shape_cast %104 : vector<8xf32> to vector<8x1xf32>
    %106 = tpu.reciprocal %105 {approx = true} : vector<8x1xf32> -> vector<8x1xf32>
    %107 = vector.broadcast %106 : vector<8x1xf32> to vector<8x8xf32>
    %108 = arith.mulf %103, %107 : vector<8x8xf32>
    %109 = arith.truncf %108 : vector<8x8xf32> to vector<8x8xbf16>
    %110 = arith.truncf %95 : vector<8x8xf32> to vector<8x8xbf16>
    %cst_34 = arith.constant dense<0.000000e+00> : vector<8x8xf32>
    %111 = tpu.matmul %109, %110, %cst_34 {dimension_numbers = #tpu.dot_dimension_numbers<[1], [0], [0], [1], [0, 0, 1, 1], [], []>} : vector<8x8xbf16>, vector<8x8xbf16>, vector<8x8xf32> -> vector<8x8xf32>
    %112 = tpu.concatenate %54, %73, %92, %111 in 1 : vector<8x8xf32>, vector<8x8xf32>, vector<8x8xf32>, vector<8x8xf32> -> vector<8x32xf32>
    %113 = arith.truncf %112 : vector<8x32xf32> to vector<8x32xbf16>
    %c0_35 = arith.constant 0 : index
    %c0_36 = arith.constant 0 : index
    %c0_37 = arith.constant 0 : index
    %114 = vector.load %arg5[%c0_35, %c0_36, %c0_37] : memref<1x32x32xbf16, #tpu.memory_space<vmem>>, vector<1x32x32xbf16>
    %115 = vector.shape_cast %114 : vector<1x32x32xbf16> to vector<32x32xbf16>
    %cst_38 = arith.constant dense<0.000000e+00> : vector<8x32xf32>
    %116 = tpu.matmul %113, %115, %cst_38 {dimension_numbers = #tpu.dot_dimension_numbers<[1], [0], [0], [1], [0, 0, 1, 1], [], []>} : vector<8x32xbf16>, vector<32x32xbf16>, vector<8x32xf32> -> vector<8x32xf32>
    %c0_39 = arith.constant 0 : index
    %c0_40 = arith.constant 0 : index
    %c0_41 = arith.constant 0 : index
    %117 = vector.load %arg6[%c0_39, %c0_40, %c0_41] : memref<1x1x32xf32, #tpu.memory_space<vmem>>, vector<1x1x32xf32>
    %118 = vector.shape_cast %117 : vector<1x1x32xf32> to vector<1x32xf32>
    %119 = vector.broadcast %118 : vector<1x32xf32> to vector<8x32xf32>
    %120 = arith.addf %116, %119 : vector<8x32xf32>
    %121 = arith.addf %3, %120 : vector<8x32xf32>
    %c0_42 = arith.constant 0 : index
    %c0_43 = arith.constant 0 : index
    %c0_44 = arith.constant 0 : index
    %122 = vector.load %arg13[%c0_42, %c0_43, %c0_44] : memref<1x1x32xf32, #tpu.memory_space<vmem>>, vector<1x1x32xf32>
    %123 = vector.shape_cast %122 : vector<1x1x32xf32> to vector<1x32xf32>
    %c0_45 = arith.constant 0 : index
    %c0_46 = arith.constant 0 : index
    %c0_47 = arith.constant 0 : index
    %124 = vector.load %arg14[%c0_45, %c0_46, %c0_47] : memref<1x1x32xf32, #tpu.memory_space<vmem>>, vector<1x1x32xf32>
    %125 = vector.shape_cast %124 : vector<1x1x32xf32> to vector<1x32xf32>
    %cst_48 = arith.constant dense<0.000000e+00> : vector<8xf32>
    %126 = vector.multi_reduction <add>, %121, %cst_48 [1] : vector<8x32xf32> to vector<8xf32>
    %127 = vector.shape_cast %126 : vector<8xf32> to vector<8x1xf32>
    %cst_49 = arith.constant 3.200000e+01 : f32
    %128 = vector.broadcast %cst_49 : f32 to vector<8x1xf32>
    %129 = arith.divf %127, %128 : vector<8x1xf32>
    %130 = vector.broadcast %129 : vector<8x1xf32> to vector<8x32xf32>
    %131 = arith.subf %121, %130 : vector<8x32xf32>
    %132 = arith.mulf %131, %131 : vector<8x32xf32>
    %cst_50 = arith.constant dense<0.000000e+00> : vector<8xf32>
    %133 = vector.multi_reduction <add>, %132, %cst_50 [1] : vector<8x32xf32> to vector<8xf32>
    %134 = vector.shape_cast %133 : vector<8xf32> to vector<8x1xf32>
    %cst_51 = arith.constant 0.0322580636 : f32
    %135 = vector.broadcast %cst_51 : f32 to vector<8x1xf32>
    %136 = arith.mulf %134, %135 : vector<8x1xf32>
    %137 = vector.broadcast %123 : vector<1x32xf32> to vector<8x32xf32>
    %138 = arith.mulf %137, %131 : vector<8x32xf32>
    %139 = math.sqrt %136 : vector<8x1xf32>
    %cst_52 = arith.constant 9.99999997E-7 : f32
    %140 = vector.broadcast %cst_52 : f32 to vector<8x1xf32>
    %141 = arith.addf %139, %140 : vector<8x1xf32>
    %142 = vector.broadcast %141 : vector<8x1xf32> to vector<8x32xf32>
    %143 = arith.divf %138, %142 : vector<8x32xf32>
    %144 = vector.broadcast %125 : vector<1x32xf32> to vector<8x32xf32>
    %145 = arith.addf %143, %144 : vector<8x32xf32>
    %146 = arith.truncf %145 : vector<8x32xf32> to vector<8x32xbf16>
    %c0_53 = arith.constant 0 : index
    %c0_54 = arith.constant 0 : index
    %c0_55 = arith.constant 0 : index
    %147 = vector.load %arg7[%c0_53, %c0_54, %c0_55] : memref<1x32x64xbf16, #tpu.memory_space<vmem>>, vector<1x32x64xbf16>
    %148 = vector.shape_cast %147 : vector<1x32x64xbf16> to vector<32x64xbf16>
    %cst_56 = arith.constant dense<0.000000e+00> : vector<8x64xf32>
    %149 = tpu.matmul %146, %148, %cst_56 {dimension_numbers = #tpu.dot_dimension_numbers<[1], [0], [0], [1], [0, 0, 1, 1], [], []>} : vector<8x32xbf16>, vector<32x64xbf16>, vector<8x64xf32> -> vector<8x64xf32>
    %c0_57 = arith.constant 0 : index
    %c0_58 = arith.constant 0 : index
    %c0_59 = arith.constant 0 : index
    %150 = vector.load %arg8[%c0_57, %c0_58, %c0_59] : memref<1x1x64xf32, #tpu.memory_space<vmem>>, vector<1x1x64xf32>
    %151 = vector.shape_cast %150 : vector<1x1x64xf32> to vector<1x64xf32>
    %152 = vector.broadcast %151 : vector<1x64xf32> to vector<8x64xf32>
    %153 = arith.addf %149, %152 : vector<8x64xf32>
    %cst_60 = arith.constant 0.000000e+00 : f32
    %154 = vector.broadcast %cst_60 : f32 to vector<8x64xf32>
    %155 = arith.maximumf %153, %154 : vector<8x64xf32>
    %156 = arith.truncf %155 : vector<8x64xf32> to vector<8x64xbf16>
    %c0_61 = arith.constant 0 : index
    %c0_62 = arith.constant 0 : index
    %c0_63 = arith.constant 0 : index
    %157 = vector.load %arg9[%c0_61, %c0_62, %c0_63] : memref<1x64x32xbf16, #tpu.memory_space<vmem>>, vector<1x64x32xbf16>
    %158 = vector.shape_cast %157 : vector<1x64x32xbf16> to vector<64x32xbf16>
    %cst_64 = arith.constant dense<0.000000e+00> : vector<8x32xf32>
    %159 = tpu.matmul %156, %158, %cst_64 {dimension_numbers = #tpu.dot_dimension_numbers<[1], [0], [0], [1], [0, 0, 1, 1], [], []>} : vector<8x64xbf16>, vector<64x32xbf16>, vector<8x32xf32> -> vector<8x32xf32>
    %c0_65 = arith.constant 0 : index
    %c0_66 = arith.constant 0 : index
    %c0_67 = arith.constant 0 : index
    %160 = vector.load %arg10[%c0_65, %c0_66, %c0_67] : memref<1x1x32xf32, #tpu.memory_space<vmem>>, vector<1x1x32xf32>
    %161 = vector.shape_cast %160 : vector<1x1x32xf32> to vector<1x32xf32>
    %162 = vector.broadcast %161 : vector<1x32xf32> to vector<8x32xf32>
    %163 = arith.addf %159, %162 : vector<8x32xf32>
    %164 = arith.addf %121, %163 : vector<8x32xf32>
    %c0_68 = arith.constant 0 : index
    %c0_69 = arith.constant 0 : index
    %165 = vector.load %arg18[%c0_68, %c0_69] : memref<8x32xf32, #tpu.memory_space<vmem>>, vector<8x32xf32>
    tpu.vector_store %arg18[%c0_68, %c0_69], %164 {strides = array<i32>} : memref<8x32xf32, #tpu.memory_space<vmem>>, vector<8x32xf32>,
    %c1_i32 = arith.constant 1 : i32
    %166 = arith.cmpi eq, %arg1, %c1_i32 : i32
    %167 = arith.extui %166 : i1 to i32
    %c0_i32_70 = arith.constant 0 : i32
    %168 = arith.cmpi ne, %167, %c0_i32_70 : i32
    scf.if %168 {
      %c0_71 = arith.constant 0 : index
      %c0_72 = arith.constant 0 : index
      %169 = vector.load %arg15[%c0_71, %c0_72] : memref<1x32xf32, #tpu.memory_space<vmem>>, vector<1x32xf32>
      %c0_73 = arith.constant 0 : index
      %c0_74 = arith.constant 0 : index
      %170 = vector.load %arg16[%c0_73, %c0_74] : memref<1x32xf32, #tpu.memory_space<vmem>>, vector<1x32xf32>
      %cst_75 = arith.constant dense<0.000000e+00> : vector<8xf32>
      %171 = vector.multi_reduction <add>, %164, %cst_75 [1] : vector<8x32xf32> to vector<8xf32>
      %172 = vector.shape_cast %171 : vector<8xf32> to vector<8x1xf32>
      %cst_76 = arith.constant 3.200000e+01 : f32
      %173 = vector.broadcast %cst_76 : f32 to vector<8x1xf32>
      %174 = arith.divf %172, %173 : vector<8x1xf32>
      %175 = vector.broadcast %174 : vector<8x1xf32> to vector<8x32xf32>
      %176 = arith.subf %164, %175 : vector<8x32xf32>
      %177 = arith.mulf %176, %176 : vector<8x32xf32>
      %cst_77 = arith.constant dense<0.000000e+00> : vector<8xf32>
      %178 = vector.multi_reduction <add>, %177, %cst_77 [1] : vector<8x32xf32> to vector<8xf32>
      %179 = vector.shape_cast %178 : vector<8xf32> to vector<8x1xf32>
      %cst_78 = arith.constant 0.0322580636 : f32
      %180 = vector.broadcast %cst_78 : f32 to vector<8x1xf32>
      %181 = arith.mulf %179, %180 : vector<8x1xf32>
      %182 = vector.broadcast %169 : vector<1x32xf32> to vector<8x32xf32>
      %183 = arith.mulf %182, %176 : vector<8x32xf32>
      %184 = math.sqrt %181 : vector<8x1xf32>
      %cst_79 = arith.constant 9.99999997E-7 : f32
      %185 = vector.broadcast %cst_79 : f32 to vector<8x1xf32>
      %186 = arith.addf %184, %185 : vector<8x1xf32>
      %187 = vector.broadcast %186 : vector<8x1xf32> to vector<8x32xf32>
      %188 = arith.divf %183, %187 : vector<8x32xf32>
      %189 = vector.broadcast %170 : vector<1x32xf32> to vector<8x32xf32>
      %190 = arith.addf %188, %189 : vector<8x32xf32>
      %c0_80 = arith.constant 0 : index
      %c0_81 = arith.constant 0 : index
      %c0_82 = arith.constant 0 : index
      %191 = vector.load %arg17[%c0_80, %c0_81, %c0_82] : memref<1x8x32xf32, #tpu.memory_space<vmem>>, vector<1x8x32xf32>
      %192 = vector.shape_cast %191 : vector<1x8x32xf32> to vector<8x32xf32>
      %193 = vector.shape_cast %190 : vector<8x32xf32> to vector<1x8x32xf32>
      tpu.vector_store %arg17[%c0_80, %c0_81, %c0_82], %193 {strides = array<i32>} : memref<1x8x32xf32, #tpu.memory_space<vmem>>, vector<1x8x32xf32>,
    } else {
    }
    return
  }
  func.func @transform_0(%arg0: i32, %arg1: i32) -> (i32, i32, i32) {
    %c0_i32 = arith.constant 0 : i32
    %c0_i32_0 = arith.constant 0 : i32
    %c0_i32_1 = arith.constant 0 : i32
    return %arg0, %c0_i32, %c0_i32_0 : i32, i32, i32
  }
  func.func @transform_1(%arg0: i32, %arg1: i32) -> (i32, i32, i32) {
    %c0_i32 = arith.constant 0 : i32
    %c0_i32_0 = arith.constant 0 : i32
    %c0_i32_1 = arith.constant 0 : i32
    return %arg1, %c0_i32, %c0_i32_0 : i32, i32, i32
  }
  func.func @transform_2(%arg0: i32, %arg1: i32) -> (i32, i32, i32) {
    %c0_i32 = arith.constant 0 : i32
    %c0_i32_0 = arith.constant 0 : i32
    %c0_i32_1 = arith.constant 0 : i32
    return %arg1, %c0_i32, %c0_i32_0 : i32, i32, i32
  }
  func.func @transform_3(%arg0: i32, %arg1: i32) -> (i32, i32, i32) {
    %c0_i32 = arith.constant 0 : i32
    %c0_i32_0 = arith.constant 0 : i32
    %c0_i32_1 = arith.constant 0 : i32
    return %arg1, %c0_i32, %c0_i32_0 : i32, i32, i32
  }
  func.func @transform_4(%arg0: i32, %arg1: i32) -> (i32, i32, i32) {
    %c0_i32 = arith.constant 0 : i32
    %c0_i32_0 = arith.constant 0 : i32
    %c0_i32_1 = arith.constant 0 : i32
    return %arg1, %c0_i32, %c0_i32_0 : i32, i32, i32
  }
  func.func @transform_5(%arg0: i32, %arg1: i32) -> (i32, i32, i32) {
    %c0_i32 = arith.constant 0 : i32
    %c0_i32_0 = arith.constant 0 : i32
    %c0_i32_1 = arith.constant 0 : i32
    return %arg1, %c0_i32, %c0_i32_0 : i32, i32, i32
  }
  func.func @transform_6(%arg0: i32, %arg1: i32) -> (i32, i32, i32) {
    %c0_i32 = arith.constant 0 : i32
    %c0_i32_0 = arith.constant 0 : i32
    %c0_i32_1 = arith.constant 0 : i32
    return %arg1, %c0_i32, %c0_i32_0 : i32, i32, i32
  }
  func.func @transform_7(%arg0: i32, %arg1: i32) -> (i32, i32, i32) {
    %c0_i32 = arith.constant 0 : i32
    %c0_i32_0 = arith.constant 0 : i32
    %c0_i32_1 = arith.constant 0 : i32
    return %arg1, %c0_i32, %c0_i32_0 : i32, i32, i32
  }
  func.func @transform_8(%arg0: i32, %arg1: i32) -> (i32, i32, i32) {
    %c0_i32 = arith.constant 0 : i32
    %c0_i32_0 = arith.constant 0 : i32
    %c0_i32_1 = arith.constant 0 : i32
    return %arg1, %c0_i32, %c0_i32_0 : i32, i32, i32
  }
  func.func @transform_9(%arg0: i32, %arg1: i32) -> (i32, i32, i32) {
    %c0_i32 = arith.constant 0 : i32
    %c0_i32_0 = arith.constant 0 : i32
    %c0_i32_1 = arith.constant 0 : i32
    return %arg1, %c0_i32, %c0_i32_0 : i32, i32, i32
  }
  func.func @transform_10(%arg0: i32, %arg1: i32) -> (i32, i32, i32) {
    %c0_i32 = arith.constant 0 : i32
    %c0_i32_0 = arith.constant 0 : i32
    %c0_i32_1 = arith.constant 0 : i32
    return %arg1, %c0_i32, %c0_i32_0 : i32, i32, i32
  }
  func.func @transform_11(%arg0: i32, %arg1: i32) -> (i32, i32, i32) {
    %c0_i32 = arith.constant 0 : i32
    %c0_i32_0 = arith.constant 0 : i32
    %c0_i32_1 = arith.constant 0 : i32
    return %arg1, %c0_i32, %c0_i32_0 : i32, i32, i32
  }
  func.func @transform_12(%arg0: i32, %arg1: i32) -> (i32, i32, i32) {
    %c0_i32 = arith.constant 0 : i32
    %c0_i32_0 = arith.constant 0 : i32
    %c0_i32_1 = arith.constant 0 : i32
    return %arg1, %c0_i32, %c0_i32_0 : i32, i32, i32
  }
  func.func @transform_13(%arg0: i32, %arg1: i32) -> (i32, i32) {
    %c0_i32 = arith.constant 0 : i32
    %c0_i32_0 = arith.constant 0 : i32
    %c0_i32_1 = arith.constant 0 : i32
    return %c0_i32, %c0_i32_0 : i32, i32
  }
  func.func @transform_14(%arg0: i32, %arg1: i32) -> (i32, i32) {
    %c0_i32 = arith.constant 0 : i32
    %c0_i32_0 = arith.constant 0 : i32
    %c0_i32_1 = arith.constant 0 : i32
    return %c0_i32, %c0_i32_0 : i32, i32
  }
  func.func @transform_15(%arg0: i32, %arg1: i32) -> (i32, i32, i32) {
    %c0_i32 = arith.constant 0 : i32
    %c0_i32_0 = arith.constant 0 : i32
    %c0_i32_1 = arith.constant 0 : i32
    return %arg0, %c0_i32, %c0_i32_0 : i32, i32, i32
  }
}

</mosaic_0001>

<bundles_post_ra>
// kernel: encoder_forward.1
= control target key start
LH: loop header
LB: loop body
LE: loop exit
PB: predicated region body
PF: predicated region fallthrough
CT: control target
= control target key end

     0   :  { %s3144_s0 = inlined_call_operand.hbm [shape: f32[2,8,32], index: 0, kind: input, shape index: {}]   ;;  %s3145_s1 = inlined_call_operand.vmem [shape: bf16[2,32,96], index: 1, kind: input, shape index: {}]   ;;  %s3146_s2 = inlined_call_operand.vmem [shape: f32[2,1,96], index: 2, kind: input, shape index: {}]   ;;  %s3147_s3 = inlined_call_operand.vmem [shape: bf16[2,32,32], index: 3, kind: input, shape index: {}]   ;;  %s3148_s4 = inlined_call_operand.vmem [shape: f32[2,1,32], index: 4, kind: input, shape index: {}]   ;;  %s3149_s5 = inlined_call_operand.vmem [shape: bf16[2,32,64], index: 5, kind: input, shape index: {}]   ;;  %s3150_s6 = inlined_call_operand.hbm [shape: f32[2,1,64], index: 6, kind: input, shape index: {}]   ;;  %s3151_s7 = inlined_call_operand.vmem [shape: bf16[2,64,32], index: 7, kind: input, shape index: {}]   ;;  %s3152_s8 = inlined_call_operand.vmem [shape: f32[2,1,32], index: 8, kind: input, shape index: {}]   ;;  %s3153_s9 = inlined_call_operand.vmem [shape: f32[2,1,32], index: 9, kind: input, shape index: {}]   ;;  %s3154_s10 = inlined_call_operand.vmem [shape: f32[2,1,32], index: 10, kind: input, shape index: {}]   ;;  %s3155_s11 = inlined_call_operand.vmem [shape: f32[2,1,32], index: 11, kind: input, shape index: {}]   ;;  %s3156_s12 = inlined_call_operand.hbm [shape: f32[2,1,32], index: 12, kind: input, shape index: {}]   ;;  %s3157_s13 = inlined_call_operand.vmem [shape: f32[1,32], index: 13, kind: input, shape index: {}]   ;;  %s3158_s14 = inlined_call_operand.hbm [shape: f32[1,32], index: 14, kind: input, shape index: {}]   ;;  %s3159_s15 = inlined_call_operand.hbm [shape: f32[2,8,32], index: 15, kind: output, shape index: {}]  }
   0x1   :  { %3186 = sst [smem:[#allocation33_spill]] %s3144_s0 }
   0x2   :  { %3187 = sst [smem:[#allocation34_spill]] %s3145_s1 }
   0x3   :  { %3188 = sst [smem:[#allocation35_spill]] %s3147_s3 }
   0x4   :  { %3189 = sst [smem:[#allocation36_spill]] %s3148_s4 }
   0x5   :  { %3190 = sst [smem:[#allocation37_spill]] %s3149_s5 }
   0x6   :  { %3191 = sst [smem:[#allocation38_spill]] %s3150_s6 }
   0x7   :  { %3192 = sst [smem:[#allocation39_spill]] %s3151_s7 }
   0x8   :  { %3193 = sst [smem:[#allocation40_spill]] %s3152_s8 }
   0x9   :  { %3194 = sst [smem:[#allocation41_spill]] %s3153_s9 }
   0xa   :  { %3195 = sst [smem:[#allocation42_spill]] %s3154_s10 }
   0xb   :  { %3196 = sst [smem:[#allocation43_spill]] %s3155_s11 }
   0xc   :  { %3197 = sst [smem:[#allocation44_spill]] %s3156_s12 }
   0xd   :  { %3198 = sst [smem:[#allocation45_spill]] %s3157_s13 }
   0xe   :  { %3199 = sst [smem:[#allocation46_spill]] %s3158_s14 }
   0xf   :  { %3200 = sst [smem:[#allocation47_spill]] %s3159_s15 }
  0x10   :  { %20 = vsyncpa [#allocation4], 0 }
  0x11   :  { %22 = vsyncpa [#allocation4 + $0x1], 0 }
  0x12   :  { %23 = vsyncpa [#allocation7], 0 }
  0x13   :  { %25 = vsyncpa [#allocation7 + $0x1], 0 }
  0x14   :  { %26 = vsyncpa [#allocation10], 0 }
  0x15   :  { %27 = vsyncpa [#allocation5], 0 }
  0x16   :  { %29 = vsyncpa [#allocation5 + $0x1], 0  ;;  %s2585_s18 = smov 0   ;;  %s2587_s19 = smov 0  }
  0x17   :  { %s2589_s20 = smov 0   ;;  %s2591_s21 = smov 0  }
  0x18   :  { %s2593_s22 = smov 0   ;;  %s2595_s23 = smov 0  }
  0x19   :  { %s2597_s24 = smov 0   ;;  %s2599_s25 = smov 0  }
  0x1a   :  { %s2601_s26 = smov 0   ;;  %s2603_s27 = smov 0  }
  0x1b   :  { %s2605_s28 = smov 0  }
  0x1c LB: > { %3201 = sst [smem:[#allocation16_spill]] %s2446_s19  ;;  %s44_s29 = sadd.s32 1, %s2474_s26  ;;  %s2482_s28 = sphi %s2605_s28, %s35_s28   ;;  %s2478_s27 = sphi %s2603_s27, %s3279_s27   ;;  %s2474_s26 = sphi %s2601_s26, %s3278_s26   ;;  %s2470_s25 = sphi %s2599_s25, %s3277_s25   ;;  %s2466_s24 = sphi %s2597_s24, %s3276_s24   ;;  %s2462_s23 = sphi %s2595_s23, %s3275_s23   ;;  %s2458_s22 = sphi %s2593_s22, %s3274_s22   ;;  %s2454_s21 = sphi %s2591_s21, %s3273_s21   ;;  %s2450_s20 = sphi %s2589_s20, %s3272_s20   ;;  %s2446_s19 = sphi %s2587_s19, %s3271_s19   ;;  %s2442_s18 = sphi %s2585_s18, %s3270_s18  }
  0x1d   : > { %3202 = sst [smem:[#allocation17_spill]] %s2450_s20  ;;  %p3165_p0 = scmp.eq.s32.totalorder %s2482_s28, 0 }
  0x1e   : > { %3203 = sst [smem:[#allocation18_spill]] %s2454_s21  ;;  %p2642_p1 = scmp.ge.s32.totalorder %s44_s29, 2 }
  0x1f   : > { %3204 = sst [smem:[#allocation19_spill]] %s2458_s22  ;;  %s210_s16 = sadd.s32 1, %s2450_s20 }
  0x20   : > { %3205 = sst [smem:[#allocation20_spill]] %s2462_s23  ;;  %p217_p2 = scmp.ne.s32.totalorder %s2450_s20, %s2446_s19 }
  0x21   : > { %3206 = sst [smem:[#allocation21_spill]] %s2470_s25  ;;  %s3281_s29 = smov (%p2642_p1, %s44_s29), 0 }
  0x22   : > { %3207 = sst [smem:[#allocation22_spill]] %s2474_s26  ;;  %p219_p3 = por %p217_p2, %p3165_p0 }
  0x23   : > { %3208 = sst [smem:[#allocation23_spill]] %s2478_s27  ;;  %p3164_p4 = scmp.lt.s32.totalorder %s2482_s28, 4 }
  0x24   : > { %3209 = sst [smem:[#allocation24_spill]] %s2482_s28  ;;  %s207_s17 = ssub.s32 %s2474_s26, %s3281_s29 }
  0x25   : > { %3211 = sst [smem:[#allocation25_spill]] %s3281_s29  ;;  %s539_s15 = sand.u32 1, %s2482_s28  }
  0x26   : > { %p208_p5 = scmp.eq.s32.totalorder %s207_s17, 0  ;;  %s3163_s25 = sand.u32 1, %s2450_s20  }
  0x27   : > { %s1887_s13 = sshll.u32 %s2474_s26, 4  ;;  %s3213_s6 = sld [smem:[#allocation38_spill]] }
  0x28   : > { %s2662_s11 = scalar_select %p208_p5, %s2450_s20, %s210_s16  }
  0x29   : > { %s542_s8 = scalar_lea.vmem [#allocation6], %s3163_s25  ;;  %p2673_p6 = pnand %p3164_p4, %p219_p3 }
  0x2a   : > { %3212 = sst [smem:[#allocation26_spill]] %s2662_s11  ;;  %s549_s5 = sshll.u32 %s542_s8, 4  ;;  %s2677_s5 = int_to_ptr.vmem [resolvable:$true] %s549_s5 }
  0x2b   : > { %s3214_s29 = scalar_select %p2673_p6, 1, 0 }
  0x2c   : > { %s3215_s12 = sld [smem:[#allocation44_spill]]  ;;  %s2684_s17 = scalar_lea.sflag [#allocation7], %s539_s15 }
  0x2d   : > { %s2667_s7 = scalar_lea.hbm %s3213_s6, %s1887_s13  ;;  %p3166_p8 = pneg %p2673_p6 }
  0x2e   : > { %s2234_s26 = scalar_lea.hbm %s2667_s7, 16  ;;  %s2239_s11 = scalar_lea.hbm %s3213_s6, 32 }
  0x2f   : > { %p2235_p7 = scmp.ne.s32.totalorder %s2667_s7, %s2234_s26  ;;  %p2240_p11 = scmp.lt.u32.totalorder %s2667_s7, %s3213_s6 }
  0x30   : > { %p2241_p12 = scmp.lt.u32.totalorder %s2239_s11, %s2234_s26  ;;  %p2243_p2 = scmp.lt.u32.totalorder %s2234_s26, %s2667_s7 }
  0x31   : > { %p2237_p9 = pnand %p3166_p8, %p2235_p7 }
  0x32   : > { %s2682_s10 = scalar_lea.hbm %s3215_s12, %s1887_s13  ;;  %p2242_p13 = por %p2241_p12, %p2240_p11 }
  0x33   : > { %p2238_p10 = pneg %p2237_p9 }
  0x34   : > { %p2244_p3 = por %p2243_p2, %p2242_p13 }
  0x36   : > { %p2245_p5 = pnand %p2244_p3, %p2238_p10 }
  0x38   : > { %2248 = shalt.err (!%p2245_p5)
}
  0x39   : > { %s2249_s13 = scalar_lea.vmem %s2677_s5, 16  ;;  %s2484_s15 = smov [#allocation6]  }
  0x3a   : > { %p2250_p7 = scmp.ne.s32.totalorder %s2677_s5, %s2249_s13  ;;  %s2254_s25 = sshll.u32 %s2484_s15, 4  ;;  %s2255_s25 = int_to_ptr.vmem [resolvable:$false] %s2254_s25 }
  0x3b   : > { %s2256_s3 = scalar_lea.vmem %s2255_s25, 32  ;;  %p2257_p0 = scmp.lt.s32.totalorder %s2677_s5, %s2255_s25 }
  0x3c   : > { %p2252_p9 = pnand %p2250_p7, %p3166_p8  ;;  %p2258_p11 = scmp.lt.s32.totalorder %s2256_s3, %s2249_s13 }
  0x3e   : > { %p2253_p4 = pneg %p2252_p9  ;;  %p2259_p12 = por %p2258_p11, %p2257_p0 }
  0x40   : > { %p2260_p13 = pnand %p2259_p12, %p2253_p4 }
  0x42   : > { %2263 = shalt.err (!%p2260_p13)
}
  0x43   : > { %2079 = dma.hbm_to_vmem [thread:$0]  (!%p2673_p6), %s2667_s7, 16, %s2677_s5, %s2684_s17  }
  0x44   : > { %s2713_s4 = sadd.s32 4294967295, %s2482_s28   ;;  %s1881_s11 = sadd.s32 4294967294, %s2482_s28  }
  0x45   : > { %p67_p0 = scmp.ne.s32.totalorder %s2458_s22, %s2454_s21  ;;  %p3169_p4 = scmp.eq.s32.totalorder %s2713_s4, 0 }
  0x46   : > { %p223_p10 = scmp.ne.s32.totalorder %s2446_s19, %s2442_s18  ;;  %p451_p5 = scmp.eq.s32.totalorder %s1881_s11, 3 }
  0x47   : > { %p2724_p3 = por %p3169_p4, %p67_p0  ;;  %p1882_p9 = scmp.ge.s32.totalorder %s2482_s28, 1 }
  0x48   : > { %p2730_p7 = por %p223_p10, %p3169_p4  ;;  %p2735_p11 = por %p451_p5, %p67_p0 }
  0x49   : > { %s3216_s26 = scalar_select %p2724_p3, 1, 0 }
  0x4a   : > { %s3217_s5 = scalar_select %p2730_p7, 1, 0 }
  0x4b   : > { %s3218_s7 = scalar_select %p2735_p11, 1, 0 }
  0x4c   : > { %p458_p12 = scmp.lt.s32.totalorder %s2482_s28, 5  ;;  %s2485_s16 = smov [#allocation9]  }
  0x4d   : > { %3219 = sst [smem:[#allocation27_spill]] %s3218_s7  ;;  %s474_s9 = sshll.u32 %s2485_s16, 4  ;;  %s475_s9 = int_to_ptr.vmem [resolvable:$true] %s474_s9 }
  0x4e   : > { %p2740_p13 = pnand %p1882_p9, %p458_p12  ;;  %s47_s13 = sadd.s32 1, %s2478_s27 }
  0x4f   : > { %s3283_s13 = smov (!%p2642_p1, %s47_s13), %s2478_s27  ;;  %s54_s15 = sadd.s32 1, %s2462_s23 }
  0x50   : > { %s3220_s18 = scalar_select %p2740_p13, 1, 0 }
  0x51   : > { %p2069_p8 = pneg %p2740_p13  ;;  %s3222_s14 = sld [smem:[#allocation46_spill]] }
  0x53   : > { %p2748_p10 = pnand %p2069_p8, %p3169_p4 }
  0x55   : > { %p2266_p5 = pneg %p2748_p10 }
  0x57   : > { %s2264_s11 = scalar_lea.hbm %s3222_s14, 16 }
  0x58   : > { %p2265_p0 = scmp.ne.s32.totalorder %s3222_s14, %s2264_s11  ;;  %p2271_p12 = scmp.lt.u32.totalorder %s2264_s11, %s3222_s14 }
  0x5a   : > { %p2267_p9 = pnand %p2266_p5, %p2265_p0 }
  0x5c   : > { %p2268_p8 = pneg %p2267_p9 }
  0x5e   : > { %p2273_p4 = pnand %p2271_p12, %p2268_p8 }
  0x60   : > { %2276 = shalt.err (!%p2273_p4)
}
  0x61   : > { %s2277_s30 = scalar_lea.vmem %s475_s9, 16  ;;  %s2284_s25 = scalar_lea.vmem %s475_s9, 32 }
  0x62   : > { %p2278_p1 = scmp.ne.s32.totalorder %s475_s9, %s2277_s30  ;;  %p2285_p7 = scmp.lt.s32.totalorder %s475_s9, %s475_s9 }
  0x63   : > { %p2286_p3 = scmp.lt.s32.totalorder %s2284_s25, %s2277_s30 }
  0x64   : > { %p2280_p2 = pnand %p2278_p1, %p2266_p5 }
  0x65   : > { %p2287_p13 = por %p2286_p3, %p2285_p7 }
  0x66   : > { %p2281_p11 = pneg %p2280_p2 }
  0x68   : > { %p2288_p6 = pnand %p2287_p13, %p2281_p11 }
  0x6a   : > { %2291 = shalt.err (!%p2288_p6)
}
  0x6b   : > { %2072 = dma.hbm_to_vmem [thread:$0]  (!%p2748_p10), %s3222_s14, 16, %s475_s9, [#allocation10]  }
  0x6c   : > { %p49_p4 = scmp.ge.s32.totalorder %s3283_s13, 2  ;;  %p61_p2 = scmp.ne.s32.totalorder %s2462_s23, %s2458_s22 }
  0x6d   : > { %s485_s21 = sand.u32 1, %s2462_s23   ;;  %s1886_s3 = sshll.u32 %s2478_s27, 7 }
  0x6e   : > { %s3285_s13 = smov (%p49_p4, %s3283_s13), 0  ;;  %p3224_p6 = scmp.eq.s32.totalorder %s2482_s28, 0 }
  0x6f   : > { %3223 = sst [smem:[#allocation28_spill]] %s3285_s13  ;;  %p3225_p7 = scmp.eq.s32.totalorder %s2713_s4, 3 }
  0x70   : > { %p63_p3 = por %p3224_p6, %p61_p2  ;;  %s51_s11 = ssub.s32 %s2478_s27, %s3285_s13 }
  0x71   : > { %p2783_p11 = por %p3225_p7, %p61_p2  ;;  %p52_p13 = scmp.eq.s32.totalorder %s51_s11, 0 }
  0x72   : > { %s1885_s16 = sshll.u32 %s485_s21, 3  ;;  %s3228_s0 = sld [smem:[#allocation33_spill]] }
  0x73   : > { %s3226_s8 = scalar_select %p2783_p11, 1, 0 }
  0x74   : > { %s2797_s6 = scalar_select %p52_p13, %s2462_s23, %s54_s15  }
  0x75   : > { %3227 = sst [smem:[#allocation29_spill]] %s3226_s8  ;;  %s489_s7 = scalar_lea.vmem [#allocation3], %s1885_s16 }
  0x76   : > { %3229 = sst [smem:[#allocation30_spill]] %s2797_s6  ;;  %s496_s14 = sshll.u32 %s489_s7, 4  ;;  %s2805_s14 = int_to_ptr.vmem [resolvable:$true] %s496_s14 }
  0x77   : > { %p3230_p10 = scmp.lt.s32.totalorder %s2482_s28, 4  ;;  %s486_s9 = scalar_lea.sflag [#allocation4], %s485_s21 }
  0x78   : > { %s2792_s25 = scalar_lea.hbm %s3228_s0, %s1886_s3  ;;  %s3232_s3 = sand.u32 1, %s2450_s20  }
  0x79   : > { %p2801_p0 = pnand %p3230_p10, %p63_p3  ;;  %s591_s11 = scalar_lea.vmem [#allocation8], %s3232_s3 }
  0x7a   : > { %s598_s30 = sshll.u32 %s591_s11, 4  ;;  %s2292_s15 = scalar_lea.hbm %s2792_s25, 128  ;;  %s2809_s30 = int_to_ptr.vmem [resolvable:$true] %s598_s30 }
  0x7b   : > { %p2293_p5 = scmp.ne.s32.totalorder %s2792_s25, %s2292_s15  ;;  %p2294_p9 = pneg %p2801_p0 }
  0x7c   : > { %s2297_s13 = scalar_lea.hbm %s3228_s0, 256  ;;  %p2298_p1 = scmp.lt.u32.totalorder %s2792_s25, %s3228_s0 }
  0x7d   : > { %p2295_p8 = pnand %p2294_p9, %p2293_p5  ;;  %p2299_p4 = scmp.lt.u32.totalorder %s2297_s13, %s2292_s15 }
  0x7e   : > { %p2301_p6 = scmp.lt.u32.totalorder %s2292_s15, %s2792_s25 }
  0x7f   : > { %p2296_p12 = pneg %p2295_p8  ;;  %p2300_p2 = por %p2299_p4, %p2298_p1 }
  0x81   : > { %p2302_p3 = por %p2301_p6, %p2300_p2 }
  0x83   : > { %p2303_p7 = pnand %p2302_p3, %p2296_p12 }
  0x85   : > { %2306 = shalt.err (!%p2303_p7)
}
  0x86   : > { %s2307_s21 = scalar_lea.vmem %s2805_s14, 128  ;;  %s2486_s3 = smov [#allocation3]  }
  0x87   : > { %p2308_p13 = scmp.ne.s32.totalorder %s2805_s14, %s2307_s21  ;;  %s2312_s11 = sshll.u32 %s2486_s3, 4  ;;  %s2313_s11 = int_to_ptr.vmem [resolvable:$false] %s2312_s11 }
  0x88   : > { %s2314_s27 = scalar_lea.vmem %s2313_s11, 256  ;;  %p2315_p8 = scmp.lt.s32.totalorder %s2805_s14, %s2313_s11 }
  0x89   : > { %p2310_p10 = pnand %p2308_p13, %p2294_p9  ;;  %p2316_p1 = scmp.lt.s32.totalorder %s2314_s27, %s2307_s21 }
  0x8b   : > { %p2311_p5 = pneg %p2310_p10  ;;  %p2317_p4 = por %p2316_p1, %p2315_p8 }
  0x8d   : > { %p2318_p2 = pnand %p2317_p4, %p2311_p5 }
  0x8f   : > { %2321 = shalt.err (!%p2318_p2)
}
  0x90   : > { %2076 = dma.hbm_to_vmem [thread:$0]  (!%p2801_p0), %s2792_s25, 128, %s2805_s14, %s486_s9  }
  0x91   : > { %s2322_s13 = scalar_lea.hbm %s2682_s10, 16  ;;  %p3233_p12 = scmp.ne.s32.totalorder %s3214_s29, 0 }
  0x92   : > { %p2323_p9 = scmp.ne.s32.totalorder %s2682_s10, %s2322_s13  ;;  %s2327_s16 = scalar_lea.hbm %s3215_s12, 32 }
  0x93   : > { %p3234_p6 = pneg %p3233_p12  ;;  %p2328_p13 = scmp.lt.u32.totalorder %s2682_s10, %s3215_s12 }
  0x94   : > { %p2329_p10 = scmp.lt.u32.totalorder %s2327_s16, %s2322_s13  ;;  %p2331_p8 = scmp.lt.u32.totalorder %s2322_s13, %s2682_s10 }
  0x95   : > { %p2325_p3 = pnand %p2323_p9, %p3234_p6 }
  0x96   : > { %p2330_p5 = por %p2329_p10, %p2328_p13 }
  0x97   : > { %p2326_p7 = pneg %p2325_p3 }
  0x98   : > { %p2332_p1 = por %p2331_p8, %p2330_p5 }
  0x9a   : > { %p2333_p4 = pnand %p2332_p1, %p2326_p7 }
  0x9c   : > { %2336 = shalt.err (!%p2333_p4)
}
  0x9d   : > { %s2337_s14 = scalar_lea.vmem %s2809_s30, 16  ;;  %p3235_p2 = pmov %p3234_p6 }
  0x9e   : > { %p2338_p0 = scmp.ne.s32.totalorder %s2809_s30, %s2337_s14  ;;  %s2487_s25 = smov [#allocation8]  }
  0x9f   : > { %s2342_s9 = sshll.u32 %s2487_s25, 4  ;;  %s2343_s9 = int_to_ptr.vmem [resolvable:$false] %s2342_s9 }
  0xa0   : > { %p2340_p9 = pnand %p2338_p0, %p3235_p2  ;;  %s2344_s21 = scalar_lea.vmem %s2343_s9, 32 }
  0xa1   : > { %p2345_p3 = scmp.lt.s32.totalorder %s2809_s30, %s2343_s9  ;;  %p2346_p13 = scmp.lt.s32.totalorder %s2344_s21, %s2337_s14 }
  0xa2   : > { %p2341_p6 = pneg %p2340_p9 }
  0xa3   : > { %p2347_p10 = por %p2346_p13, %p2345_p3 }
  0xa5   : > { %p2348_p5 = pnand %p2347_p10, %p2341_p6 }
  0xa7   : > { %2351 = shalt.err (!%p2348_p5)
}
  0xa8   : > { %2082 = dma.hbm_to_vmem [thread:$0]  (!%p3233_p12), %s2682_s10, 16, %s2809_s30, %s2684_s17  }
  0xa9   : > { %p3236_p7 = scmp.ne.s32.totalorder %s3220_s18, 0 }
  0xab   : > { %607 = sbr.rel (%p3236_p7) target bundleno = 3124 (0xc34), region = 80 }
  0xb2   : > { %s2863_s3 = sand.u32 1, %s2458_s22   ;;  %p3238_p8 = scmp.ne.s32.totalorder %s3216_s26, 0 }
  0xb3   : > { %3237 = sst [smem:[#allocation31_spill]] %s2863_s3  ;;  %s1890_s11 = sshll.u32 %s2863_s3, 3 }
  0xb4   : > { %s610_s27 = scalar_lea.sflag [#allocation4], %s2863_s3  ;;  %s613_s13 = scalar_lea.vmem [#allocation3], %s1890_s11 }
  0xb5   : > { %2425 = dma.done.wait (%p3238_p8), %s610_s27, 128  }
  0xb6   : > { %2427 = vsyncadd (%p3238_p8), %s610_s27, 4294967168  ;;  %s618_s29 = sand.u32 1, %s2713_s4   ;;  %s620_s10 = sand.u32 1, %s2446_s19  }
  0xb7   : > { %s619_s17 = scalar_lea.sflag [#allocation7], %s618_s29  ;;  %s2873_s18 = scalar_lea.vmem [#allocation6], %s620_s10 }
  0xb8   : > { %3239 = sst [smem:[#allocation32_spill]] %s2873_s18  ;;  %p3240_p12 = scmp.ne.s32.totalorder %s3217_s5, 0 }
  0xba   : > { %2429 = dma.done.wait (%p3240_p12), %s619_s17, 32  }
  0xbb   : > { %2431 = vsyncadd (%p3240_p12), %s619_s17, 4294967264  ;;  %s2879_s30 = scalar_lea.vmem [#allocation8], %s620_s10  ;;  %p3241_p1 = scmp.eq.s32.totalorder %s2713_s4, 0 }
  0xbd   : > { %2433 = dma.done.wait (%p3241_p1), [#allocation10], 16   ;;  %p3242_p4 = pmov %p3241_p1 }
  0xbe   : > { %p726_p0 = scmp.lt.s32.totalorder %s2466_s24, 1  ;;  %s3243_s1 = sld [smem:[#allocation34_spill]] }
  0xbf   : > { %2435 = vsyncadd (%p3242_p4), [#allocation10], 4294967280  ;;  %s3244_s9 = sld [smem:[#allocation35_spill]]  ;;  %s3246_s23 = sld [smem:[#allocation37_spill]] }
  0xc0   : > { %s2887_s26 = scalar_select %p726_p0, %s2466_s24, 1 }
  0xc1   : > { %s3247_s4 = sld [smem:[#allocation40_spill]]  ;;  %s3248_s19 = sld [smem:[#allocation39_spill]] }
  0xc2   : > { %s1939_s5 = sshll.u32 %s2887_s26, 4  ;;  %s1942_s6 = sshll.u32 %s2887_s26, 5 }
  0xc3   : > { %s3249_s28 = sld [smem:[#allocation41_spill]]  ;;  %s3250_s17 = sld [smem:[#allocation42_spill]] }
  0xc4   : > { %s2897_s8 = scalar_lea.vmem %s3243_s1, %s1939_s5  ;;  %s2935_s18 = scalar_lea.vmem [#allocation11], %s1890_s11 }
  0xc5   : > { %s2902_s21 = scalar_lea.vmem %s3244_s9, %s1939_s5  ;;  %s2911_s22 = scalar_lea.vmem %s3246_s23, %s1939_s5 }
  0xc6   : > { %s3251_s5 = sld [smem:[#allocation43_spill]]  ;;  %p1901_p2 = scmp.ne.s32.totalorder %s2466_s24, 0 }
  0xc7   : > { %s754_s7 = scalar_lea.vmem %s3247_s4, %s2887_s26  ;;  %s2921_s14 = scalar_lea.vmem %s3248_s19, %s1942_s6  ;;  %v769_v0 = vld [vmem:[%s613_s13] sm:$0xff] (!%p1901_p2)  ;;  %vm770_vm0 = vcmask (!%p1901_p2), 261120  }
  0xc8   : > { %768 = sbr.rel (%p1901_p2) target bundleno = 207 (0xcf), region = 100  ;;  %771 = vst.msk [vmem:[#allocation2] sm:$0xff] (!%p1901_p2), %vm770_vm0, %v769_v0 }
  0xc9   : > { %s757_s27 = scalar_lea.vmem %s3249_s28, %s2887_s26  ;;  %s760_s0 = scalar_lea.vmem %s3250_s17, %s2887_s26 }
  0xcc   : > { %s763_s3 = scalar_lea.vmem %s3251_s5, %s2887_s26 }
  0xcf PF: > { %v2938_v1 = vld [vmem:[#allocation2] sm:$0xff]  ;;  %vm775_vm1 = vcmask 261120   ;;  %v2488_v9 = vmov 0.0   ;;  %vm2489_vm2 = vmmov 0   ;;  %v2197_v10 = vld [vmem:[%s2897_s8 + $0x8] sm:$0xff]   ;;  %s3254_s17 = scalar_lea.vmem %s3146_s2, %s2887_s26  ;;  %s2490_s6 = smov 120  }
  0xd0   : > { %v776_v2 = vsel %vm775_vm1, %v2938_v1, 0.0  ;;  %v2196_v8 = vld [vmem:[%s2897_s8] sm:$0xff]   ;;  %1973 = vmatprep.subr.bf16.mxu0 %v2488_v9  ;;  %1977 = vmatprep.mubr.msk.bf16.mxu0 %vm2489_vm2, %v2488_v9  ;;  %s2491_s15 = smov 96   ;;  %s2492_s4 = smov 88   ;;  %vm882_vm5 = vcmask 64512   ;;  %vm946_vm6 = vcmask 1043456  }
  0xd1   : > { %777 = vadd.xlane.f32.xlu0 %v776_v2  ;;  %1974 = vmatpush3.bf16.msra.mxu0 %v2196_v8  ;;  %v1902_v19 = vld [vmem:[%s757_s27] ss:$0 sm:$0xff]  ;;  %s2493_s25 = smov 80   ;;  %s2494_s9 = smov 112   ;;  %vm1333_vm7 = vcmask 130048   ;;  %vm1335_vm8 = vcmask 195584  }
  0xd2   : > { %1981 = vmatprep.subr.bf16.mxu1 %v2488_v9  ;;  %1975 = vmatprep.subr.bf16.mxu0 %v2488_v9  ;;  %v1903_v22 = vld [vmem:[%s760_s0] ss:$0 sm:$0xff]  ;;  %s2495_s27 = smov 72   ;;  %s2496_s29 = smov 104   ;;  %vm1549_vm11 = vcmask 523264  }
  0xd3   : > { %1983 = vmatprep.mubr.msk.bf16.mxu1 %vm2489_vm2, %v2488_v9  ;;  %v1904_v26 = vld [vmem:[%s3254_s17] ss:$0 sm:$0xff]  ;;  %s2497_s10 = smov 64   ;;  %s2498_s0 = smov 56  }
  0xd4   : > { %s2499_s12 = smov 48   ;;  %s2500_s23 = smov 40  }
  0xd5   : > { %1976 = vmatpush3.bf16.msra.mxu0 %v2197_v10  ;;  %s2501_s5 = smov 8   ;;  %s2502_s1 = smov 16  }
  0xd6   : > { %1987 = vmatprep.subr.bf16.mxu0 %v2488_v9  ;;  %s2503_s19 = smov 24   ;;  %s3255_s28 = sld [smem:[#allocation36_spill]] }
  0xd7   : > { %p1932_p9 = scmp.ne.s32.totalorder %s2466_s24, 1 }
  0xdc   : > { %s3256_s11 = scalar_lea.vmem %s3255_s28, %s2887_s26 }
 0x15e   : > { %v778_v3 = vpop.xlane.xlu0 %777 }
 0x15f   : > { %v780_v4 = vmul.f32 0.03125, %v778_v3 }
 0x161   : > { %v781_v5 = vsub.f32 %v2938_v1, %v780_v4 }
 0x163   : > { %v782_v6 = vmul.f32 %v781_v5, %v781_v5  ;;  %v793_v20 = vmul.f32 %v1902_v19, %v781_v5 }
 0x165   : > { %v783_v7 = vsel %vm775_vm1, %v782_v6, 0.0 }
 0x166   : > { %784 = vadd.xlane.f32.xlu0 %v783_v7 }
 0x1f3   : > { %v785_v11 = vpop.xlane.xlu0 %784 }
 0x1f4   : > { %v786_v12 = vmul.f32 0.032258064, %v785_v11 }
 0x1f6   : > { %2206 = vrsqrt.f32 %v786_v12  ;;  %vm796_vm3 = vcmp.eq.f32.partialorder %v786_v12, inf  ;;  %v799_v15 = vand.u32 2147483648, %v786_v12  ;;  %vm798_vm4 = vcmp.eq.f32.partialorder %v786_v12, 0.0 }
 0x200   : > { %v2207_v13 = vpop.eup %2206 }
 0x201   : > { %v795_v14 = vmul.f32 %v2207_v13, %v786_v12 }
 0x203   : > { %v797_v16 = vsel %vm796_vm3, %v786_v12, %v795_v14 }
 0x204   : > { %v800_v17 = vsel %vm798_vm4, %v799_v15, %v797_v16 }
 0x205   : > { %v801_v18 = vadd.f32 1e-06, %v800_v17 }
 0x207   : > { %2208 = vrcp.f32 %v801_v18 }
 0x211   : > { %v2209_v21 = vpop.eup %2208 }
 0x212   : > { %v803_v23 = vmul.f32 %v2209_v21, %v793_v20 }
 0x214   : > { %v810_v24 = vadd.f32 %v1903_v22, %v803_v23 }
 0x216   : > { %v811_v25 = vpack.c.bf16 %v810_v24, %v810_v24 }
 0x218   : > { %1978 = vmatmul.mubr.msk.bf16.vlgmr.msra.gmra.mrb[0].mxu0 %vm775_vm1, %v811_v25 }
 0x219   : > { %1989 = vmatprep.mubr.msk.bf16.mxu0 %vm2489_vm2, %v2488_v9 }
 0x2eb   : > { %v872_v27 = vpop.f32.mrb[0].mxu0 }
 0x2ec   : > { %v873_v28 = vadd.f32 %v1904_v26, %v872_v27  ;;  %v1979_v29 = vpop.f32.mrb[1].mxu0 }
 0x2ed   : > { %v875_v30 = vpop.f32.mrb[2].mxu0 }
 0x2ee   : > { %v2972_v31 = vpack.c.bf16 %v873_v28, %v873_v28  ;;  %v1980_v32 = vpop.f32.mrb[3].mxu0 }
 0x2f0   : > { %990 = vrot.lane.b32.xlu0 %v2972_v31, %s2490_s6  ;;  %880 = vrot.lane.b32.xlu1 %v2972_v31, %s2491_s15 }
 0x2f4   : > { %992 = vrot.lane.b32.xlu1 %v2972_v31, %s2492_s4 }
 0x2f8   : > { %1102 = vrot.lane.b32.xlu1 %v2972_v31, %s2493_s25 }
 0x2fc   : > { %1100 = vrot.lane.b32.xlu1 %v2972_v31, %s2494_s9 }
 0x300   : > { %1212 = vrot.lane.b32.xlu1 %v2972_v31, %s2495_s27 }
 0x304   : > { %1210 = vrot.lane.b32.xlu1 %v2972_v31, %s2496_s29 }
 0x362   : > { %v881_v33 = vpop.permute.xlu1 %880  ;;  %v991_v38 = vpop.permute.xlu0 %990 }
 0x363   : > { %v887_v34 = vsel %vm882_vm5, %v881_v33, 0 }
 0x364   : > { %1982 = vmatpush3.bf16.xpose.msra.mxu1 %v887_v34 }
 0x365   : > { %1993 = vmatprep.subr.bf16.mxu1 %v2488_v9 }
 0x366   : > { %v993_v35 = vpop.permute.xlu1 %992 }
 0x367   : > { %v998_v36 = vsel %vm882_vm5, %v993_v35, 0 }
 0x36a   : > { %v1103_v37 = vpop.permute.xlu1 %1102 }
 0x36b   : > { %1984 = vmatmul.mubr.msk.bf16.vlgmr.msra.gmra.mrb[0].mxu1 %vm882_vm5, %v2972_v31  ;;  %v1108_v40 = vsel %vm882_vm5, %v1103_v37, 0 }
 0x36c   : > { %1994 = vmatpush3.bf16.xpose.msra.mxu1 %v998_v36  ;;  %1995 = vmatprep.mubr.msk.bf16.mxu1 %vm2489_vm2, %v2488_v9 }
 0x36d   : > { %2005 = vmatprep.subr.bf16.mxu1 %v2488_v9 }
 0x36e   : > { %v1101_v39 = vpop.permute.xlu1 %1100 }
 0x372   : > { %v1213_v41 = vpop.permute.xlu1 %1212 }
 0x373   : > { %1996 = vmatmul.mubr.msk.bf16.vlgmr.msra.gmra.mrb[4].mxu1 %vm882_vm5, %v991_v38  ;;  %v1218_v42 = vsel %vm882_vm5, %v1213_v41, 0 }
 0x374   : > { %2006 = vmatpush3.bf16.xpose.msra.mxu1 %v1108_v40  ;;  %2007 = vmatprep.mubr.msk.bf16.mxu1 %vm2489_vm2, %v2488_v9 }
 0x375   : > { %2017 = vmatprep.subr.bf16.mxu1 %v2488_v9 }
 0x376   : > { %v1211_v43 = vpop.permute.xlu1 %1210 }
 0x37b   : > { %2008 = vmatmul.mubr.msk.bf16.vlgmr.msra.gmra.mrb[8].mxu1 %vm882_vm5, %v1101_v39 }
 0x37c   : > { %2018 = vmatpush3.bf16.xpose.msra.mxu1 %v1218_v42  ;;  %2019 = vmatprep.mubr.msk.bf16.mxu1 %vm2489_vm2, %v2488_v9 }
 0x37d   : > { %2029 = vmatprep.subr.bf16.mxu1 %v2488_v9 }
 0x383   : > { %2020 = vmatmul.mubr.msk.bf16.vlgmr.msra.gmra.mrb[12].mxu1 %vm882_vm5, %v1211_v43 }
 0x384   : > { %2033 = vmatprep.mubr.msk.bf16.mxu1 %vm2489_vm2, %v2488_v9 }
 0x43e   : > { %v923_v44 = vpop.f32.mrb[0].mxu1 }
 0x43f   : > { %v1985_v45 = vpop.f32.mrb[1].mxu1  ;;  %v929_v46 = vsel %vm882_vm5, %v923_v44, -inf }
 0x440   : > { %930 = vmax.xlane.f32.xlu1 %v929_v46  ;;  %v926_v47 = vpop.f32.mrb[2].mxu1 }
 0x441   : > { %v1986_v48 = vpop.f32.mrb[3].mxu1 }
 0x446   : > { %v1034_v49 = vpop.f32.mrb[4].mxu1 }
 0x447   : > { %v1997_v50 = vpop.f32.mrb[5].mxu1  ;;  %v1040_v51 = vsel %vm882_vm5, %v1034_v49, -inf }
 0x448   : > { %1041 = vmax.xlane.f32.xlu0 %v1040_v51  ;;  %v1037_v52 = vpop.f32.mrb[6].mxu1 }
 0x449   : > { %v1998_v53 = vpop.f32.mrb[7].mxu1 }
 0x44e   : > { %v1144_v54 = vpop.f32.mrb[8].mxu1 }
 0x44f   : > { %v2009_v55 = vpop.f32.mrb[9].mxu1  ;;  %v1150_v56 = vsel %vm882_vm5, %v1144_v54, -inf }
 0x450   : > { %1151 = vmax.xlane.f32.xlu1 %v1150_v56  ;;  %v1147_v57 = vpop.f32.mrb[10].mxu1  ;;  %v2199_v55 = vld [vmem:[%s2902_s21 + $0x8] sm:$0xff]  }
 0x451   : > { %v2010_v58 = vpop.f32.mrb[11].mxu1 }
 0x456   : > { %v1254_v59 = vpop.f32.mrb[12].mxu1 }
 0x457   : > { %v2021_v60 = vpop.f32.mrb[13].mxu1  ;;  %v1260_v61 = vsel %vm882_vm5, %v1254_v59, -inf }
 0x458   : > { %1261 = vmax.xlane.f32.xlu0 %v1260_v61  ;;  %v1257_v62 = vpop.f32.mrb[14].mxu1 }
 0x459   : > { %v2022_v63 = vpop.f32.mrb[15].mxu1 }
 0x4cd   : > { %v931_v0 = vpop.xlane.xlu1 %930 }
 0x4ce   : > { %v932_v2 = vsub.f32 %v923_v44, %v931_v0 }
 0x4d0   : > { %v933_v3 = vmul.f32 1.442695, %v932_v2 }
 0x4d2   : > { %2210 = vpow2.f32 %v933_v3 }
 0x4d5   : > { %v1042_v4 = vpop.xlane.xlu0 %1041 }
 0x4d6   : > { %v1043_v5 = vsub.f32 %v1034_v49, %v1042_v4 }
 0x4d8   : > { %v1044_v6 = vmul.f32 1.442695, %v1043_v5 }
 0x4da   : > { %2212 = vpow2.f32 %v1044_v6 }
 0x4dc   : > { %v2211_v7 = vpop.eup %2210 }
 0x4dd   : > { %v935_v8 = vsel %vm882_vm5, %v2211_v7, 0.0  ;;  %v1152_v17 = vpop.xlane.xlu1 %1151 }
 0x4de   : > { %936 = vadd.xlane.f32.xlu1 %v935_v8  ;;  %v1153_v18 = vsub.f32 %v1144_v54, %v1152_v17  ;;  %v2198_v54 = vld [vmem:[%s2902_s21] sm:$0xff]  }
 0x4df   : > { %2030 = vmatpush3.bf16.msra.mxu1 %v2198_v54  ;;  %v1916_v8 = vld [vmem:[%s3256_s11] ss:$0 sm:$0xff] }
 0x4e0   : > { %v1154_v19 = vmul.f32 1.442695, %v1153_v18  ;;  %2031 = vmatprep.subr.bf16.mxu1 %v2488_v9 }
 0x4e3   : > { %2032 = vmatpush3.bf16.msra.mxu1 %v2199_v55 }
 0x4e4   : > { %v2213_v10 = vpop.eup %2212  ;;  %2045 = vmatprep.subr.bf16.mxu1 %v2488_v9 }
 0x4e5   : > { %v1262_v11 = vpop.xlane.xlu0 %1261  ;;  %v1046_v12 = vsel %vm882_vm5, %v2213_v10, 0.0 }
 0x4e6   : > { %v1263_v13 = vsub.f32 %v1254_v59, %v1262_v11  ;;  %1047 = vadd.xlane.f32.xlu0 %v1046_v12 }
 0x4e8   : > { %v1264_v14 = vmul.f32 1.442695, %v1263_v13 }
 0x4ea   : > { %2214 = vpow2.f32 %v1264_v14 }
 0x4eb   : > { %2216 = vpow2.f32 %v1154_v19 }
 0x4ef   : > { %941 = vrot.lane.b32.xlu1 %v2972_v31, %s2497_s10 }
 0x4f4   : > { %v2215_v15 = vpop.eup %2214 }
 0x4f5   : > { %v1266_v16 = vsel %vm882_vm5, %v2215_v15, 0.0  ;;  %v2217_v20 = vpop.eup %2216 }
 0x4f6   : > { %1267 = vadd.xlane.f32.xlu0 %v1266_v16  ;;  %v1156_v21 = vsel %vm882_vm5, %v2217_v20, 0.0 }
 0x50c   : > { %1052 = vrot.lane.b32.xlu0 %v2972_v31, %s2498_s0 }
 0x513   : > { %1157 = vadd.xlane.f32.xlu1 %v1156_v21 }
 0x524   : > { %1162 = vrot.lane.b32.xlu1 %v2972_v31, %s2499_s12 }
 0x528   : > { %1272 = vrot.lane.b32.xlu1 %v2972_v31, %s2500_s23 }
 0x56b   : > { %v937_v22 = vpop.xlane.xlu1 %936 }
 0x56c   : > { %2218 = vrcp.f32 %v937_v22  ;;  %v2200_v22 = vld [vmem:[%s2911_s22] sm:$0xff]  }
 0x56f   : > { %v942_v23 = vpop.permute.xlu1 %941 }
 0x570   : > { %v948_v24 = vsel %vm946_vm6, %v942_v23, 0  ;;  %v2201_v23 = vld [vmem:[%s2911_s22 + $0x8] sm:$0xff]   ;;  %s3257_s22 = sld [smem:[#allocation32_spill]] }
 0x571   : > { %1988 = vmatpush3.bf16.msra.mxu0 %v948_v24  ;;  %v2202_v24 = vld [vmem:[%s2921_s14] sm:$0xff]  }
 0x572   : > { %1999 = vmatprep.subr.bf16.mxu0 %v2488_v9 }
 0x573   : > { %v1048_v26 = vpop.xlane.xlu0 %1047 }
 0x574   : > { %2220 = vrcp.f32 %v1048_v26 }
 0x576   : > { %v2219_v25 = vpop.eup %2218 }
 0x577   : > { %v939_v27 = vmul.f32 %v2219_v25, %v2211_v7 }
 0x579   : > { %v940_v28 = vpack.c.bf16 %v939_v27, %v939_v27 }
 0x57b   : > { %1990 = vmatmul.mubr.msk.bf16.vlgmr.msra.gmra.mrb[4].mxu0 %vm882_vm5, %v940_v28 }
 0x57c   : > { %2001 = vmatprep.mubr.msk.bf16.mxu0 %vm2489_vm2, %v2488_v9 }
 0x57e   : > { %v2221_v29 = vpop.eup %2220 }
 0x57f   : > { %v1050_v31 = vmul.f32 %v2221_v29, %v2213_v10 }
 0x581   : > { %v1051_v34 = vpack.c.bf16 %v1050_v31, %v1050_v31 }
 0x583   : > { %v1268_v30 = vpop.xlane.xlu0 %1267 }
 0x587   : > { %v1053_v32 = vpop.permute.xlu0 %1052 }
 0x588   : > { %v1058_v33 = vsel %vm946_vm6, %v1053_v32, 0 }
 0x589   : > { %2000 = vmatpush3.bf16.msra.mxu0 %v1058_v33  ;;  %v1920_v33 = vld [vmem:[%s763_s3] ss:$0 sm:$0xff] }
 0x58a   : > { %2011 = vmatprep.subr.bf16.mxu0 %v2488_v9 }
 0x58c   : > { %2002 = vmatmul.mubr.msk.bf16.vlgmr.msra.gmra.mrb[8].mxu0 %vm882_vm5, %v1051_v34 }
 0x58d   : > { %2013 = vmatprep.mubr.msk.bf16.mxu0 %vm2489_vm2, %v2488_v9 }
 0x5a0   : > { %v1158_v35 = vpop.xlane.xlu1 %1157 }
 0x5a1   : > { %2222 = vrcp.f32 %v1158_v35 }
 0x5a2   : > { %2224 = vrcp.f32 %v1268_v30 }
 0x5a4   : > { %v1163_v36 = vpop.permute.xlu1 %1162 }
 0x5a5   : > { %v1168_v37 = vsel %vm946_vm6, %v1163_v36, 0  ;;  %v1921_v36 = vld [vmem:[%s2879_s30] ss:$0 sm:$0xff] }
 0x5a6   : > { %2012 = vmatpush3.bf16.msra.mxu0 %v1168_v37 }
 0x5a7   : > { %2023 = vmatprep.subr.bf16.mxu0 %v2488_v9 }
 0x5a8   : > { %v1273_v40 = vpop.permute.xlu1 %1272 }
 0x5a9   : > { %v1278_v43 = vsel %vm946_vm6, %v1273_v40, 0  ;;  %v2204_v40 = vld [vmem:[%s2921_s14 + $0x10] sm:$0xff]  }
 0x5ab   : > { %v2223_v38 = vpop.eup %2222 }
 0x5ac   : > { %v1160_v39 = vmul.f32 %v2223_v38, %v2217_v20  ;;  %v2225_v42 = vpop.eup %2224 }
 0x5ad   : > { %v1270_v44 = vmul.f32 %v2225_v42, %v2215_v15  ;;  %v1922_v42 = vld [vmem:[%s3257_s22] ss:$0 sm:$0xff] }
 0x5ae   : > { %v1161_v41 = vpack.c.bf16 %v1160_v39, %v1160_v39 }
 0x5af   : > { %v1271_v45 = vpack.c.bf16 %v1270_v44, %v1270_v44 }
 0x5b0   : > { %2014 = vmatmul.mubr.msk.bf16.vlgmr.msra.gmra.mrb[12].mxu0 %vm882_vm5, %v1161_v41  ;;  %v2205_v41 = vld [vmem:[%s2921_s14 + $0x18] sm:$0xff]  }
 0x5b1   : > { %2024 = vmatpush3.bf16.msra.mxu0 %v1278_v43  ;;  %2025 = vmatprep.mubr.msk.bf16.mxu0 %vm2489_vm2, %v2488_v9 }
 0x5b2   : > { %2037 = vmatprep.subr.bf16.mxu0 %v2488_v9 }
 0x5b8   : > { %2026 = vmatmul.mubr.msk.bf16.vlgmr.msra.gmra.mrb[16].mxu0 %vm882_vm5, %v1271_v45 }
 0x5b9   : > { %2041 = vmatprep.mubr.msk.bf16.mxu0 %vm2489_vm2, %v2488_v9  ;;  %2038 = vmatpush3.bf16.msra.mxu0 %v2200_v22 }
 0x5ba   : > { %2039 = vmatprep.subr.bf16.mxu0 %v2488_v9 }
 0x5bd   : > { %2040 = vmatpush3.bf16.msra.mxu0 %v2201_v23 }
 0x64e   : > { %v984_v46 = vpop.f32.mrb[4].mxu0 }
 0x64f   : > { %v1991_v47 = vpop.f32.mrb[5].mxu0 }
 0x650   : > { %v987_v48 = vpop.f32.mrb[6].mxu0 }
 0x651   : > { %v1992_v49 = vpop.f32.mrb[7].mxu0 }
 0x65f   : > { %v1094_v50 = vpop.f32.mrb[8].mxu0 }
 0x660   : > { %1321 = vrot.lane.b32.xlu0 %v1094_v50, %s2501_s5  ;;  %v2003_v51 = vpop.f32.mrb[9].mxu0  ;;  %v1926_v50 = vld [vmem:[%s754_s7] ss:$0 sm:$0xff]  ;;  %s3260_s7 = sld [smem:[#allocation45_spill]] (!%p1932_p9) }
 0x661   : > { %v1097_v52 = vpop.f32.mrb[10].mxu0 }
 0x662   : > { %v2004_v53 = vpop.f32.mrb[11].mxu0 }
 0x683   : > { %v1204_v56 = vpop.f32.mrb[12].mxu0 }
 0x684   : > { %1325 = vrot.lane.b32.xlu1 %v1204_v56, %s2502_s1  ;;  %v2015_v57 = vpop.f32.mrb[13].mxu0 }
 0x685   : > { %v1207_v58 = vpop.f32.mrb[14].mxu0 }
 0x686   : > { %v2016_v59 = vpop.f32.mrb[15].mxu0 }
 0x68b   : > { %v1314_v60 = vpop.f32.mrb[16].mxu0 }
 0x68c   : > { %1329 = vrot.lane.b32.xlu0 %v1314_v60, %s2503_s19  ;;  %v2027_v61 = vpop.f32.mrb[17].mxu0 }
 0x68d   : > { %v1317_v62 = vpop.f32.mrb[18].mxu0 }
 0x68e   : > { %v2028_v63 = vpop.f32.mrb[19].mxu0 }
 0x6d2   : > { %v1322_v0 = vpop.permute.xlu0 %1321 }
 0x6d3   : > { %v1332_v3 = vsel %vm882_vm5, %v984_v46, %v1322_v0 }
 0x6f6   : > { %v1326_v2 = vpop.permute.xlu1 %1325 }
 0x6f7   : > { %v1334_v4 = vsel %vm1333_vm7, %v1332_v3, %v1326_v2 }
 0x6fe   : > { %v1330_v5 = vpop.permute.xlu0 %1329 }
 0x6ff   : > { %v1336_v6 = vsel %vm1335_vm8, %v1334_v4, %v1330_v5 }
 0x700   : > { %v1337_v7 = vpack.c.bf16 %v1336_v6, %v1336_v6 }
 0x702   : > { %2034 = vmatmul.mubr.msk.bf16.vlgmr.msra.gmra.mrb[16].mxu1 %vm775_vm1, %v1337_v7  ;;  %v1933_v7 = vld [vmem:[%s3260_s7] ss:$0 sm:$0xff] (!%p1932_p9) }
 0x703   : > { %2053 = vmatprep.mubr.msk.bf16.mxu1 %vm2489_vm2, %v2488_v9  ;;  %2046 = vmatpush3.bf16.msra.mxu1 %v2202_v24 }
 0x704   : > { %2047 = vmatprep.subr.bf16.mxu1 %v2488_v9 }
 0x7d5   : > { %v1398_v10 = vpop.f32.mrb[16].mxu1 }
 0x7d6   : > { %v1399_v11 = vadd.f32 %v1916_v8, %v1398_v10  ;;  %v2035_v12 = vpop.f32.mrb[17].mxu1 }
 0x7d7   : > { %v1401_v13 = vpop.f32.mrb[18].mxu1 }
 0x7d8   : > { %v1404_v14 = vadd.f32 %v1399_v11, %v2938_v1  ;;  %v2036_v15 = vpop.f32.mrb[19].mxu1  ;;  %v2203_v1 = vld [vmem:[%s2921_s14 + $0x8] sm:$0xff]   ;;  %v1934_v11 = vld [vmem:[#allocation9] ss:$0 sm:$0xff] (!%p1932_p9) }
 0x7d9   : > { %2048 = vmatpush3.bf16.msra.mxu1 %v2203_v1 }
 0x7da   : > { %v1407_v16 = vsel %vm775_vm1, %v1404_v14, 0.0  ;;  %2049 = vmatprep.subr.bf16.mxu1 %v2488_v9 }
 0x7db   : > { %1408 = vadd.xlane.f32.xlu1 %v1407_v16 }
 0x7dd   : > { %2050 = vmatpush3.bf16.msra.mxu1 %v2204_v40 }
 0x7de   : > { %2051 = vmatprep.subr.bf16.mxu1 %v2488_v9 }
 0x7e1   : > { %2052 = vmatpush3.bf16.msra.mxu1 %v2205_v41 }
 0x868   : > { %v1409_v17 = vpop.xlane.xlu1 %1408 }
 0x869   : > { %v1410_v18 = vmul.f32 0.03125, %v1409_v17 }
 0x86b   : > { %v1411_v19 = vsub.f32 %v1404_v14, %v1410_v18 }
 0x86d   : > { %v1412_v20 = vmul.f32 %v1411_v19, %v1411_v19  ;;  %v1423_v34 = vmul.f32 %v1920_v33, %v1411_v19 }
 0x86f   : > { %v1413_v21 = vsel %vm775_vm1, %v1412_v20, 0.0 }
 0x870   : > { %1414 = vadd.xlane.f32.xlu0 %v1413_v21 }
 0x8fd   : > { %v1415_v25 = vpop.xlane.xlu0 %1414 }
 0x8fe   : > { %v1416_v26 = vmul.f32 0.032258064, %v1415_v25 }
 0x900   : > { %2226 = vrsqrt.f32 %v1416_v26  ;;  %vm1426_vm9 = vcmp.eq.f32.partialorder %v1416_v26, inf  ;;  %v1429_v29 = vand.u32 2147483648, %v1416_v26  ;;  %vm1428_vm10 = vcmp.eq.f32.partialorder %v1416_v26, 0.0 }
 0x90a   : > { %v2227_v27 = vpop.eup %2226 }
 0x90b   : > { %v1425_v28 = vmul.f32 %v2227_v27, %v1416_v26 }
 0x90d   : > { %v1427_v30 = vsel %vm1426_vm9, %v1416_v26, %v1425_v28 }
 0x90e   : > { %v1430_v31 = vsel %vm1428_vm10, %v1429_v29, %v1427_v30 }
 0x90f   : > { %v1431_v32 = vadd.f32 1e-06, %v1430_v31 }
 0x911   : > { %2228 = vrcp.f32 %v1431_v32 }
 0x91b   : > { %v2229_v35 = vpop.eup %2228 }
 0x91c   : > { %v1433_v37 = vmul.f32 %v2229_v35, %v1423_v34 }
 0x91e   : > { %v1440_v38 = vadd.f32 %v1921_v36, %v1433_v37 }
 0x920   : > { %v1441_v39 = vpack.c.bf16 %v1440_v38, %v1440_v38 }
 0x922   : > { %2042 = vmatmul.mubr.msk.bf16.vlgmr.msra.gmra.mrb[20].mxu0 %vm775_vm1, %v1441_v39 }
 0x9f5   : > { %v1502_v43 = vpop.f32.mrb[20].mxu0 }
 0x9f6   : > { %v1503_v44 = vadd.f32 %v1922_v42, %v1502_v43  ;;  %v2043_v45 = vpop.f32.mrb[21].mxu0 }
 0x9f7   : > { %v1505_v46 = vpop.f32.mrb[22].mxu0 }
 0x9f8   : > { %v1508_v47 = vmax.f32 %v1503_v44, 0.0  ;;  %v2044_v48 = vpop.f32.mrb[23].mxu0 }
 0x9fa   : > { %v1509_v49 = vpack.c.bf16 %v1508_v47, %v1508_v47 }
 0x9fc   : > { %2054 = vmatmul.mubr.msk.bf16.vlgmr.msra.gmra.mrb[20].mxu1 %vm1549_vm11, %v1509_v49 }
 0xace   : > { %1598 = sbr.rel (%p1932_p9) target bundleno = 3099 (0xc1b), region = 104 }
 0xacf   : > { %v1587_v51 = vpop.f32.mrb[20].mxu1 }
 0xad0   : > { %v1588_v52 = vadd.f32 %v1926_v50, %v1587_v51  ;;  %v2055_v9 = vpop.f32.mrb[21].mxu1 }
 0xad1   : > { %v1590_v53 = vpop.f32.mrb[22].mxu1 }
 0xad2   : > { %v1593_v54 = vadd.f32 %v1588_v52, %v1404_v14  ;;  %v2056_v55 = vpop.f32.mrb[23].mxu1 }
 0xad4   : > { %1594 = vst.msk [vmem:[#allocation2] sm:$0xff] %vm775_vm1, %v1593_v54  ;;  %v1601_v56 = vsel (!%p1932_p9), %vm775_vm1, %v1593_v54, 0.0 }
 0xad5   : > { %1602 = vadd.xlane.f32.xlu0 %v1601_v56 }
 0xb62   : > { %v1603_v57 = vpop.xlane.xlu0 %1602 }
 0xb63   : > { %v1604_v58 = vmul.f32 0.03125, %v1603_v57 }
 0xb65   : > { %v1605_v59 = vsub.f32 %v1593_v54, %v1604_v58 }
 0xb67   : > { %v1606_v60 = vmul.f32 %v1605_v59, %v1605_v59  ;;  %v1617_v8 = vmul.f32 %v1933_v7, %v1605_v59 }
 0xb69   : > { %v1607_v61 = vsel %vm775_vm1, %v1606_v60, 0.0 }
 0xb6a   : > { %1608 = vadd.xlane.f32.xlu0 %v1607_v61 }
 0xbf7   : > { %v1609_v62 = vpop.xlane.xlu0 %1608 }
 0xbf8   : > { %v1610_v63 = vmul.f32 0.032258064, %v1609_v62 }
 0xbfa   : > { %2230 = vrsqrt.f32 %v1610_v63  ;;  %vm1620_vm12 = vcmp.eq.f32.partialorder %v1610_v63, inf  ;;  %v1623_v3 = vand.u32 2147483648, %v1610_v63  ;;  %vm1622_vm13 = vcmp.eq.f32.partialorder %v1610_v63, 0.0 }
 0xc04   : > { %v2231_v0 = vpop.eup %2230 }
 0xc05   : > { %v1619_v2 = vmul.f32 %v2231_v0, %v1610_v63 }
 0xc07   : > { %v1621_v4 = vsel %vm1620_vm12, %v1610_v63, %v1619_v2 }
 0xc08   : > { %v1624_v5 = vsel %vm1622_vm13, %v1623_v3, %v1621_v4 }
 0xc09   : > { %v1625_v6 = vadd.f32 1e-06, %v1624_v5 }
 0xc0b   : > { %2232 = vrcp.f32 %v1625_v6 }
 0xc15   : > { %v2233_v10 = vpop.eup %2232 }
 0xc16   : > { %v1627_v12 = vmul.f32 %v2233_v10, %v1617_v8 }
 0xc18   : > { %v1634_v13 = vadd.f32 %v1934_v11, %v1627_v12 }
 0xc1a   : > { %1635 = vst.msk [vmem:[%s2935_s18] sm:$0xff] %vm775_vm1, %v1634_v13 }
 0xc1b PF: > { %s3261_s14 = sld [smem:[#allocation21_spill]]  ;;  %s3262_s6 = sld [smem:[#allocation31_spill]] }
 0xc1c   : > { %s3264_s27 = sld [smem:[#allocation47_spill]]  ;;  %s1650_s0 = sshll.u32 %s2935_s18, 4  ;;  %s1651_s0 = int_to_ptr.vmem [resolvable:$true] %s1650_s0 }
 0xc1d   : > { %s2352_s23 = scalar_lea.vmem %s1651_s0, 128  ;;  %s2504_s5 = smov [#allocation11]  }
 0xc1e   : > { %p2353_p6 = scmp.ne.s32.totalorder %s1651_s0, %s2352_s23  ;;  %s2356_s1 = sshll.u32 %s2504_s5, 4  ;;  %s2357_s1 = int_to_ptr.vmem [resolvable:$false] %s2356_s1 }
 0xc1f   : > { %s2358_s19 = scalar_lea.vmem %s2357_s1, 256  ;;  %p2359_p10 = scmp.lt.s32.totalorder %s1651_s0, %s2357_s1 }
 0xc20   : > { %p2354_p3 = pnand %p2353_p6, %p2783_p11  ;;  %p2360_p5 = scmp.lt.s32.totalorder %s2358_s19, %s2352_s23 }
 0xc21   : > { %s1936_s4 = sshll.u32 %s3261_s14, 7  ;;  %s1637_s12 = scalar_lea.sflag [#allocation5], %s3262_s6 }
 0xc22   : > { %s3265_s29 = smov %s3264_s27  ;;  %s3086_s10 = scalar_lea.hbm %s3264_s27, %s1936_s4 }
 0xc23   : > { %p2355_p13 = pneg %p2354_p3  ;;  %p2361_p7 = por %p2360_p5, %p2359_p10 }
 0xc25   : > { %p2362_p8 = pnand %p2361_p7, %p2355_p13 }
 0xc27   : > { %2365 = shalt.err (!%p2362_p8)
}
 0xc28   : > { %s2366_s18 = scalar_lea.hbm %s3086_s10, 128  ;;  %s2370_s28 = scalar_lea.hbm %s3265_s29, 256 }
 0xc29   : > { %p2367_p12 = scmp.ne.s32.totalorder %s3086_s10, %s2366_s18  ;;  %p2371_p0 = scmp.lt.u32.totalorder %s3086_s10, %s3265_s29 }
 0xc2a   : > { %p2372_p2 = scmp.lt.u32.totalorder %s2370_s28, %s2366_s18  ;;  %p2374_p6 = scmp.lt.u32.totalorder %s2366_s18, %s3086_s10 }
 0xc2b   : > { %p2368_p1 = pnand %p2367_p12, %p2783_p11 }
 0xc2c   : > { %p2373_p9 = por %p2372_p2, %p2371_p0 }
 0xc2d   : > { %p2369_p4 = pneg %p2368_p1 }
 0xc2e   : > { %p2375_p3 = por %p2374_p6, %p2373_p9 }
 0xc30   : > { %p2376_p13 = pnand %p2375_p3, %p2369_p4 }
 0xc32   : > { %2379 = shalt.err (!%p2376_p13)
}
 0xc33   : > { %2067 = dma.vmem_to_hbm [thread:$0]  (%p2783_p11), %s1651_s0, 128, %s3086_s10, %s1637_s12  }
 0xc34 PF: > { %s3266_s13 = sld [smem:[#allocation24_spill]]  ;;  %s3267_s16 = sld [smem:[#allocation18_spill]] }
 0xc35   : > { %s3268_s8 = sld [smem:[#allocation27_spill]] }
 0xc3a   : > { %p2090_p10 = scmp.ge.s32.totalorder %s3266_s13, 2  ;;  %s1662_s3 = sand.u32 1, %s3267_s16  }
 0xc3b   : > { %p3269_p5 = scmp.ne.s32.totalorder %s3268_s8, 0  ;;  %s1663_s30 = scalar_lea.sflag [#allocation5], %s1662_s3 }
 0xc3d   : > { %p2084_p7 = pnand %p2090_p10, %p3269_p5 }
 0xc3f   : > { %2437 = dma.done.wait (!%p2084_p7), %s1663_s30, 128  }
 0xc40   : > { %2439 = vsyncadd (!%p2084_p7), %s1663_s30, 4294967168  ;;  %s35_s28 = sadd.s32 1, %s3266_s13   ;;  %s3270_s18 = sld [smem:[#allocation16_spill]] }
 0xc41   : > { %p32_p8 = scmp.ge.s32.totalorder %s35_s28, 6   ;;  %s3271_s19 = sld [smem:[#allocation17_spill]] }
 0xc42   : > { %s3272_s20 = sld [smem:[#allocation26_spill]]  ;;  %s3273_s21 = sld [smem:[#allocation19_spill]] }
 0xc43   : > { %s3274_s22 = sld [smem:[#allocation20_spill]]  ;;  %s3275_s23 = sld [smem:[#allocation30_spill]] }
 0xc44   : > { %s3276_s24 = sld [smem:[#allocation22_spill]]  ;;  %s3277_s25 = sld [smem:[#allocation23_spill]] }
 0xc45   : > { %s3278_s26 = sld [smem:[#allocation25_spill]]  ;;  %s3279_s27 = sld [smem:[#allocation28_spill]] }
 0xc46   :  { %34 = sbr.rel (!%p32_p8) target bundleno = 28 (0x1c), region = 191 }
 0xc4d   :  { %1668 = vsyncpa [#allocation4], 1 }
 0xc4e   :  { %1670 = vsyncpa [#allocation4 + $0x1], 1 }
 0xc4f   :  { %1671 = vsyncpa [#allocation7], 1 }
 0xc50   :  { %1673 = vsyncpa [#allocation7 + $0x1], 1 }
 0xc51   :  { %1674 = vsyncpa [#allocation10], 1 }
 0xc52   :  { %1675 = vsyncpa [#allocation5], 1 }
 0xc53   :  { %1677 = vsyncpa [#allocation5 + $0x1], 1 }

</bundles_post_ra>
